<compile_context>
chip_gen: v7x
topology: tpu7x:2x2x1
jax: 0.10.0
libtpu: 0.0.40
codegen_flags: <defaults>
</compile_context>

<pallas_src>
import functools

import jax
import jax.numpy as jnp
from jax import lax
from jax.experimental import pallas as pl
from jax.experimental.pallas import tpu as pltpu


def _round_up(x, m):
    return (x + m - 1) // m * m


# ----------------------------------------------------------------------------
# Kernel 1: serial LSTM recurrence, time-blocked
# ----------------------------------------------------------------------------
def _lstm_recurrent_kernel(
    xg_ref,                  # (T_BLK, B_pad, 4H) f32   precomputed vel@W_ih + b
    hx0_ref, cx0_ref,        # (B_pad, H)         f32   initial state (read at i==0)
    w_hh_ref,                # (H, 4H)            bf16  resident recurrent weight
    h_seq_out,               # (T_BLK, B_pad, H)  f32   per-step hidden state
    hx_out, cx_out,          # (B_pad, H)         f32   final state (written at last block)
    hx_sc, cx_sc,            # VMEM scratch carry across grid iterations
    *, t_blk, t_total, mask_tail,
):
    i = pl.program_id(0)
    H = hx0_ref.shape[1]

    @pl.when(i == 0)
    def _():
        hx_sc[...] = hx0_ref[...]
        cx_sc[...] = cx0_ref[...]

    def step(t, carry):
        hx, cx = carry
        # Gate order i, f, g, o (PyTorch LSTMCell convention).  Input transform
        # and both biases are already folded into xg_ref.
        gates = xg_ref[t] + jnp.dot(hx.astype(jnp.bfloat16), w_hh_ref[...],
                                    preferred_element_type=jnp.float32)
        i_g = jax.nn.sigmoid(gates[:, 0 * H:1 * H])
        f_g = jax.nn.sigmoid(gates[:, 1 * H:2 * H])
        g_g = jnp.tanh(gates[:, 2 * H:3 * H])
        o_g = jax.nn.sigmoid(gates[:, 3 * H:4 * H])
        c_new = f_g * cx + i_g * g_g
        h_new = o_g * jnp.tanh(c_new)
        h_seq_out[t] = h_new
        if mask_tail:
            # Padded tail timesteps must not advance the carried state.
            valid = (i * t_blk + t) < t_total
            h_new = jnp.where(valid, h_new, hx)
            c_new = jnp.where(valid, c_new, cx)
        return h_new, c_new

    hx, cx = lax.fori_loop(0, t_blk, step, (hx_sc[...], cx_sc[...]),
                           unroll=True)
    hx_sc[...] = hx
    cx_sc[...] = cx

    @pl.when(i == pl.num_programs(0) - 1)
    def _():
        hx_out[...] = hx
        cx_out[...] = cx


# ----------------------------------------------------------------------------
# Kernel 2: time-batched grid / place / head-direction projections
# ----------------------------------------------------------------------------
def _projection_kernel(
    h_ref,                   # (TM, H)             f32   flattened (time*batch, H)
    w_grid_ref,              # (H, G)              bf16
    w_out_ref,               # (G, P_pad+HD_pad)   bf16  [W_place | W_hd]
    b_out_ref,               # (1, P_pad+HD_pad)   f32   (-1e30 on pad columns)
    grid_out,                # (TM, G)             f32
    logp_out,                # (TM, P_pad+HD_pad)  f32   fused log-softmax slab
    *, p_pad,
):
    # grid_layer (bias-free linear).  Dropout is eval-mode identity.
    # TODO(synk): training-mode dropout (RNG mask + 1/(1-p) scale) not implemented.
    grid_act = jnp.dot(h_ref[...].astype(jnp.bfloat16), w_grid_ref[...],
                       preferred_element_type=jnp.float32)
    grid_out[...] = grid_act

    # place + head-direction projections in one MXU pass; padded columns carry
    # a -1e30 bias so exp() == 0 and the two softmax normalizers are exact.
    logits = (jnp.dot(grid_act.astype(jnp.bfloat16), w_out_ref[...],
                      preferred_element_type=jnp.float32) + b_out_ref[...])
    p_logits = logits[:, :p_pad]
    h_logits = logits[:, p_pad:]

    p_shift = p_logits - jnp.max(p_logits, axis=-1, keepdims=True)
    h_shift = h_logits - jnp.max(h_logits, axis=-1, keepdims=True)
    p_lsm = p_shift - jnp.log(jnp.sum(jnp.exp(p_shift), axis=-1, keepdims=True))
    h_lsm = h_shift - jnp.log(jnp.sum(jnp.exp(h_shift), axis=-1, keepdims=True))
    logp_out[...] = jnp.concatenate([p_lsm, h_lsm], axis=-1)


# ----------------------------------------------------------------------------
# Wrappers
# ----------------------------------------------------------------------------
@functools.partial(jax.jit, static_argnames=("n_place_cells", "n_hd_cells"))
def path_integration_sequence(velocity_seq, hidden_state, kparams, *,
                              n_place_cells, n_hd_cells):
    """Runs T forward steps of PathIntegrationModule (2 Pallas kernels)."""
    hx0, cx0 = hidden_state
    T, B, dim_vel = velocity_seq.shape
    H = hx0.shape[1]
    FH = kparams["w_hh"].shape[1]            # 4H
    G = kparams["w_grid"].shape[1]
    PHD = kparams["w_out"].shape[1]
    HD_pad = _round_up(n_hd_cells, 128)
    P_pad = PHD - HD_pad
    B_pad = _round_up(B, 8)

    f32, bf16 = jnp.float32, jnp.bfloat16

    # ---- stage 1 (XLA): time-batched input transform, biases folded in ----
    xg = (jnp.dot(velocity_seq.reshape(T * B, dim_vel).astype(bf16),
                  kparams["w_ih"], preferred_element_type=f32)
          + kparams["b_lstm"]).reshape(T, B, FH)

    T_BLK = min(16, T)
    T_pad = _round_up(T, T_BLK)
    xg_p = jnp.zeros((T_pad, B_pad, FH), f32).at[:T, :B].set(xg)
    hx_p = jnp.zeros((B_pad, H), f32).at[:B].set(hx0.astype(f32))
    cx_p = jnp.zeros((B_pad, H), f32).at[:B].set(cx0.astype(f32))

    # ---- stage 2 (Pallas): serial recurrence, T_BLK steps per grid iter ----
    rec_grid = pltpu.PrefetchScalarGridSpec(
        num_scalar_prefetch=0,
        grid=(T_pad // T_BLK,),
        in_specs=[
            pl.BlockSpec((T_BLK, B_pad, FH), lambda i: (i, 0, 0)),   # streamed
            pl.BlockSpec((B_pad, H), lambda i: (0, 0)),              # resident
            pl.BlockSpec((B_pad, H), lambda i: (0, 0)),              # resident
            pl.BlockSpec((H, FH), lambda i: (0, 0)),                 # resident
        ],
        out_specs=(
            pl.BlockSpec((T_BLK, B_pad, H), lambda i: (i, 0, 0)),
            pl.BlockSpec((B_pad, H), lambda i: (0, 0)),
            pl.BlockSpec((B_pad, H), lambda i: (0, 0)),
        ),
        scratch_shapes=[pltpu.VMEM((B_pad, H), f32),
                        pltpu.VMEM((B_pad, H), f32)],
    )
    h_seq, hx_new, cx_new = pl.pallas_call(
        functools.partial(_lstm_recurrent_kernel, t_blk=T_BLK, t_total=T,
                          mask_tail=(T_pad != T)),
        out_shape=(jax.ShapeDtypeStruct((T_pad, B_pad, H), f32),
                   jax.ShapeDtypeStruct((B_pad, H), f32),
                   jax.ShapeDtypeStruct((B_pad, H), f32)),
        grid_spec=rec_grid,
        compiler_params=pltpu.CompilerParams(
            dimension_semantics=("arbitrary",)),   # sequential carry over time
    )(xg_p, hx_p, cx_p, kparams["w_hh"])

    # ---- stage 3 (Pallas): projections + log_softmax, time folded into M ----
    M = T * B_pad                               # multiple of 8 by construction
    TM = 256 if M >= 256 else M
    M_pad = _round_up(M, TM)
    h_flat = h_seq[:T].reshape(M, H)
    if M_pad != M:
        h_flat = jnp.concatenate([h_flat, jnp.zeros((M_pad - M, H), f32)], 0)

    proj_grid = pltpu.PrefetchScalarGridSpec(
        num_scalar_prefetch=0,
        grid=(M_pad // TM,),
        in_specs=[
            pl.BlockSpec((TM, H), lambda i: (i, 0)),
            pl.BlockSpec((H, G), lambda i: (0, 0)),
            pl.BlockSpec((G, PHD), lambda i: (0, 0)),
            pl.BlockSpec((1, PHD), lambda i: (0, 0)),
        ],
        out_specs=(
            pl.BlockSpec((TM, G), lambda i: (i, 0)),
            pl.BlockSpec((TM, PHD), lambda i: (i, 0)),
        ),
    )
    grid_flat, logp_flat = pl.pallas_call(
        functools.partial(_projection_kernel, p_pad=P_pad),
        out_shape=(jax.ShapeDtypeStruct((M_pad, G), f32),
                   jax.ShapeDtypeStruct((M_pad, PHD), f32)),
        grid_spec=proj_grid,
        compiler_params=pltpu.CompilerParams(
            dimension_semantics=("parallel",)),   # v7x: shard over both TCs
    )(h_flat, kparams["w_grid"], kparams["w_out"], kparams["b_out"])

    grid_seq = grid_flat[:M].reshape(T, B_pad, G)[:, :B, :]
    logp = logp_flat[:M].reshape(T, B_pad, PHD)
    place_seq = logp[:, :B, :n_place_cells]
    hd_seq = logp[:, :B, P_pad:P_pad + n_hd_cells]
    return grid_seq, place_seq, hd_seq, (hx_new[:B], cx_new[:B])


def path_integration_forward(velocity, hidden_state, kparams, *,
                             n_place_cells, n_hd_cells):
    """Single-step equivalent of PathIntegrationModule.forward (T == 1)."""
    g, p, h, hc = path_integration_sequence(
        velocity[None], hidden_state, kparams,
        n_place_cells=n_place_cells, n_hd_cells=n_hd_cells)
    return g[0], p[0], h[0], hc


# ----------------------------------------------------------------------------
# Parameter construction (plain JAX glue)
# ----------------------------------------------------------------------------
def make_params(key, dim_vel, n_place_cells, n_hd_cells,
                lstm_hidden_size=128, grid_layer_size=256):
    ks = jax.random.split(key, 9)
    H, G = lstm_hidden_size, grid_layer_size

    def tn(k, shape, fan):
        return (jax.random.truncated_normal(k, -2.0, 2.0, shape, jnp.float32)
                / jnp.sqrt(jnp.float32(fan)))

    w_ih = tn(ks[0], (4 * H, dim_vel), H)
    w_hh = tn(ks[1], (4 * H, H), H)
    b_ih = tn(ks[2], (4 * H,), H)
    b_hh = tn(ks[3], (4 * H,), H)
    w_grid = tn(ks[4], (G, H), G)
    w_place = tn(ks[5], (n_place_cells, G), n_place_cells)
    w_hd = tn(ks[6], (n_hd_cells, G), n_hd_cells)
    w_init_hx = tn(ks[7], (H, n_place_cells + n_hd_cells), H)
    w_init_cx = tn(ks[8], (H, n_place_cells + n_hd_cells), H)

    return {
        # pre-transposed to (in, out) so math is x @ W
        "w_ih_t": w_ih.T,                              # (dim_vel, 4H)
        "w_hh_t": w_hh.T,                              # (H, 4H)
        "b_lstm": (b_ih + b_hh).reshape(1, 4 * H),
        "w_grid_t": w_grid.T,                          # (H, G)
        "w_place_t": w_place.T,                        # (G, P)
        "b_place": jnp.zeros((1, n_place_cells), jnp.float32),
        "w_hd_t": w_hd.T,                              # (G, n_hd)
        "b_hd": jnp.zeros((1, n_hd_cells), jnp.float32),
        "w_init_hx_t": w_init_hx.T,
        "b_init_hx": jnp.zeros((H,), jnp.float32),
        "w_init_cx_t": w_init_cx.T,
        "b_init_cx": jnp.zeros((H,), jnp.float32),
    }


def pack_kernel_params(raw, dim_vel, n_place_cells, n_hd_cells):
    """Pad / fuse / bf16-cast raw params into the kernels' layout."""
    f32, bf16 = jnp.float32, jnp.bfloat16
    G = raw["w_grid_t"].shape[1]
    P_pad = _round_up(n_place_cells, 128)
    HD_pad = _round_up(n_hd_cells, 128)
    NEG = jnp.float32(-1e30)

    w_place_pad = jnp.zeros((G, P_pad), f32).at[:, :n_place_cells].set(raw["w_place_t"])
    w_hd_pad = jnp.zeros((G, HD_pad), f32).at[:, :n_hd_cells].set(raw["w_hd_t"])
    w_out = jnp.concatenate([w_place_pad, w_hd_pad], axis=1).astype(bf16)

    b_place_pad = jnp.full((1, P_pad), NEG, f32).at[:, :n_place_cells].set(raw["b_place"])
    b_hd_pad = jnp.full((1, HD_pad), NEG, f32).at[:, :n_hd_cells].set(raw["b_hd"])
    b_out = jnp.concatenate([b_place_pad, b_hd_pad], axis=1)

    return {
        "w_ih": raw["w_ih_t"].astype(bf16),         # (dim_vel, 4H)     bf16 (wrapper matmul)
        "b_lstm": raw["b_lstm"].astype(f32),        # (1, 4H)           f32 (folded in wrapper)
        "w_hh": raw["w_hh_t"].astype(bf16),         # (H, 4H)           bf16
        "w_grid": raw["w_grid_t"].astype(bf16),     # (H, G)            bf16
        "w_out": w_out,                             # (G, P_pad+HD_pad) bf16
        "b_out": b_out,                             # (1, P_pad+HD_pad) f32
    }


def initial_hidden_state(place, head_direction, raw):
    x = jnp.concatenate([place, head_direction], axis=-1)
    hx = x @ raw["w_init_hx_t"] + raw["b_init_hx"]
    cx = x @ raw["w_init_cx_t"] + raw["b_init_cx"]
    return hx, cx


# ----------------------------------------------------------------------------
# Pure-JAX reference (same bf16-weight / f32-accumulate numerics as the kernels)
# ----------------------------------------------------------------------------
def reference_sequence(vel_seq, hidden_state, raw):
    bf16 = jnp.bfloat16

    def bdot(x, w):
        return jnp.dot(x.astype(bf16), w.astype(bf16),
                       preferred_element_type=jnp.float32)

    hx, cx = hidden_state
    H = hx.shape[1]
    gs, ps, hs = [], [], []
    for t in range(vel_seq.shape[0]):
        gates = bdot(vel_seq[t], raw["w_ih_t"]) + bdot(hx, raw["w_hh_t"]) + raw["b_lstm"]
        i = jax.nn.sigmoid(gates[:, :H])
        f = jax.nn.sigmoid(gates[:, H:2 * H])
        g = jnp.tanh(gates[:, 2 * H:3 * H])
        o = jax.nn.sigmoid(gates[:, 3 * H:])
        cx = f * cx + i * g
        hx = o * jnp.tanh(cx)
        grid = bdot(hx, raw["w_grid_t"])
        place = jax.nn.log_softmax(bdot(grid, raw["w_place_t"]) + raw["b_place"], axis=-1)
        hd = jax.nn.log_softmax(bdot(grid, raw["w_hd_t"]) + raw["b_hd"], axis=-1)
        gs.append(grid); ps.append(place); hs.append(hd)
    return jnp.stack(gs), jnp.stack(ps), jnp.stack(hs), (hx, cx)


# ----------------------------------------------------------------------------
# Main
# ----------------------------------------------------------------------------
if __name__ == "__main__":
    B, T = 4, 8
    DIM_VEL, N_PLACE, N_HD = 3, 256, 12
    LSTM_H, GRID = 128, 256

    key = jax.random.PRNGKey(0)
    k_param, k_vel, k_place, k_hd = jax.random.split(key, 4)

    raw = make_params(k_param, DIM_VEL, N_PLACE, N_HD, LSTM_H, GRID)
    kparams = pack_kernel_params(raw, DIM_VEL, N_PLACE, N_HD)

    vel_seq = jax.random.normal(k_vel, (T, B, DIM_VEL), jnp.float32)
    place0 = jax.nn.softmax(jax.random.normal(k_place, (B, N_PLACE), jnp.float32), -1)
    hd0 = jax.nn.softmax(jax.random.normal(k_hd, (B, N_HD), jnp.float32), -1)
    hidden0 = initial_hidden_state(place0, hd0, raw)

    # full-sequence run (recurrent kernel + time-batched projection kernel)
    grid_seq, place_seq, hd_seq, (hx_T, cx_T) = path_integration_sequence(
        vel_seq, hidden0, kparams, n_place_cells=N_PLACE, n_hd_cells=N_HD)
    jax.block_until_ready((grid_seq, place_seq, hd_seq, hx_T, cx_T))

    # single-step (module-forward signature) == T=1 instance of the same kernels
    g1, p1, h1, (hx1, cx1) = path_integration_forward(
        vel_seq[0], hidden0, kparams, n_place_cells=N_PLACE, n_hd_cells=N_HD)
    jax.block_until_ready((g1, p1, h1, hx1, cx1))

    # sanity check against the pure-JAX reference
    r_grid, r_place, r_hd, (r_hx, r_cx) = reference_sequence(vel_seq, hidden0, raw)
    tol = dict(atol=1e-2, rtol=1e-2)
    assert jnp.allclose(grid_seq, r_grid, **tol)
    assert jnp.allclose(place_seq, r_place, **tol)
    assert jnp.allclose(hd_seq, r_hd, **tol)
    assert jnp.allclose(hx_T, r_hx, **tol)
    assert jnp.allclose(cx_T, r_cx, **tol)
    assert jnp.allclose(g1, grid_seq[0], atol=1e-4, rtol=1e-4)
    assert jnp.allclose(p1, place_seq[0], atol=1e-4, rtol=1e-4)
    assert jnp.allclose(h1, hd_seq[0], atol=1e-4, rtol=1e-4)

    print("KERNEL_OK")
</pallas_src>

<mosaic_0001>
module attributes {stable_mosaic.version = 11 : i64} {
  func.func @_lstm_recurrent_kernel(%arg0: i32, %arg1: memref<8x8x512xf32, #tpu.memory_space<vmem>>, %arg2: memref<8x128xf32, #tpu.memory_space<vmem>>, %arg3: memref<8x128xf32, #tpu.memory_space<vmem>>, %arg4: memref<128x512xbf16, #tpu.memory_space<vmem>>, %arg5: memref<8x8x128xf32, #tpu.memory_space<vmem>>, %arg6: memref<8x128xf32, #tpu.memory_space<vmem>>, %arg7: memref<8x128xf32, #tpu.memory_space<vmem>>, %arg8: memref<8x128xf32, #tpu.memory_space<vmem>>, %arg9: memref<8x128xf32, #tpu.memory_space<vmem>>) attributes {dimension_semantics = [#tpu.dimension_semantics<arbitrary>], iteration_bounds = array<i64: 1>, scalar_prefetch = 0 : i64, scratch_operands = 2 : i64, tpu.core_type = #tpu.core_type<tc>, window_params = [{transform_indices = @transform_0, window_bounds = array<i64: 8, 8, 512>}, {pipeline_mode = #tpu.pipeline_mode<synchronous>, transform_indices = @transform_1, window_bounds = array<i64: 8, 128>}, {pipeline_mode = #tpu.pipeline_mode<synchronous>, transform_indices = @transform_2, window_bounds = array<i64: 8, 128>}, {pipeline_mode = #tpu.pipeline_mode<synchronous>, transform_indices = @transform_3, window_bounds = array<i64: 128, 512>}, {transform_indices = @transform_4, window_bounds = array<i64: 8, 8, 128>}, {pipeline_mode = #tpu.pipeline_mode<synchronous>, transform_indices = @transform_5, window_bounds = array<i64: 8, 128>}, {pipeline_mode = #tpu.pipeline_mode<synchronous>, transform_indices = @transform_6, window_bounds = array<i64: 8, 128>}]} {
    %c0_i32 = arith.constant 0 : i32
    %0 = arith.cmpi eq, %arg0, %c0_i32 : i32
    %1 = arith.extui %0 : i1 to i32
    %c0_i32_0 = arith.constant 0 : i32
    %2 = arith.cmpi ne, %1, %c0_i32_0 : i32
    scf.if %2 {
      %c0_90 = arith.constant 0 : index
      %c0_91 = arith.constant 0 : index
      %298 = vector.load %arg2[%c0_90, %c0_91] : memref<8x128xf32, #tpu.memory_space<vmem>>, vector<8x128xf32>
      %c0_92 = arith.constant 0 : index
      %c0_93 = arith.constant 0 : index
      %299 = vector.load %arg8[%c0_92, %c0_93] : memref<8x128xf32, #tpu.memory_space<vmem>>, vector<8x128xf32>
      tpu.vector_store %arg8[%c0_92, %c0_93], %298 {strides = array<i32>} : memref<8x128xf32, #tpu.memory_space<vmem>>, vector<8x128xf32>,
      %c0_94 = arith.constant 0 : index
      %c0_95 = arith.constant 0 : index
      %300 = vector.load %arg3[%c0_94, %c0_95] : memref<8x128xf32, #tpu.memory_space<vmem>>, vector<8x128xf32>
      %c0_96 = arith.constant 0 : index
      %c0_97 = arith.constant 0 : index
      %301 = vector.load %arg9[%c0_96, %c0_97] : memref<8x128xf32, #tpu.memory_space<vmem>>, vector<8x128xf32>
      tpu.vector_store %arg9[%c0_96, %c0_97], %300 {strides = array<i32>} : memref<8x128xf32, #tpu.memory_space<vmem>>, vector<8x128xf32>,
    } else {
    }
    %c0 = arith.constant 0 : index
    %c0_1 = arith.constant 0 : index
    %3 = vector.load %arg8[%c0, %c0_1] : memref<8x128xf32, #tpu.memory_space<vmem>>, vector<8x128xf32>
    %c0_2 = arith.constant 0 : index
    %c0_3 = arith.constant 0 : index
    %4 = vector.load %arg9[%c0_2, %c0_3] : memref<8x128xf32, #tpu.memory_space<vmem>>, vector<8x128xf32>
    %c0_i32_4 = arith.constant 0 : i32
    %5 = arith.index_cast %c0_i32_4 : i32 to index
    %c0_5 = arith.constant 0 : index
    %c0_6 = arith.constant 0 : index
    %6 = vector.load %arg1[%5, %c0_5, %c0_6] : memref<8x8x512xf32, #tpu.memory_space<vmem>>, vector<1x8x512xf32>
    %7 = vector.shape_cast %6 : vector<1x8x512xf32> to vector<8x512xf32>
    %8 = arith.truncf %3 : vector<8x128xf32> to vector<8x128xbf16>
    %c0_7 = arith.constant 0 : index
    %c0_8 = arith.constant 0 : index
    %9 = vector.load %arg4[%c0_7, %c0_8] : memref<128x512xbf16, #tpu.memory_space<vmem>>, vector<128x512xbf16>
    %cst = arith.constant dense<0.000000e+00> : vector<8x512xf32>
    %10 = tpu.matmul %8, %9, %cst {dimension_numbers = #tpu.dot_dimension_numbers<[1], [0], [0], [1], [0, 0, 1, 1], [], []>} : vector<8x128xbf16>, vector<128x512xbf16>, vector<8x512xf32> -> vector<8x512xf32>
    %11 = arith.addf %7, %10 : vector<8x512xf32>
    %12 = vector.extract_strided_slice %11 {offsets = [0, 0], sizes = [8, 128], strides = [1, 1]} : vector<8x512xf32> to vector<8x128xf32>
    %13 = arith.negf %12 : vector<8x128xf32>
    %14 = math.exp %13 : vector<8x128xf32>
    %cst_9 = arith.constant 1.000000e+00 : f32
    %15 = vector.broadcast %cst_9 : f32 to vector<8x128xf32>
    %16 = arith.addf %15, %14 : vector<8x128xf32>
    %17 = arith.divf %15, %16 : vector<8x128xf32>
    %18 = vector.extract_strided_slice %11 {offsets = [0, 128], sizes = [8, 128], strides = [1, 1]} : vector<8x512xf32> to vector<8x128xf32>
    %19 = arith.negf %18 : vector<8x128xf32>
    %20 = math.exp %19 : vector<8x128xf32>
    %cst_10 = arith.constant 1.000000e+00 : f32
    %21 = vector.broadcast %cst_10 : f32 to vector<8x128xf32>
    %22 = arith.addf %21, %20 : vector<8x128xf32>
    %23 = arith.divf %21, %22 : vector<8x128xf32>
    %24 = vector.extract_strided_slice %11 {offsets = [0, 256], sizes = [8, 128], strides = [1, 1]} : vector<8x512xf32> to vector<8x128xf32>
    %25 = math.tanh %24 : vector<8x128xf32>
    %26 = vector.extract_strided_slice %11 {offsets = [0, 384], sizes = [8, 128], strides = [1, 1]} : vector<8x512xf32> to vector<8x128xf32>
    %27 = arith.negf %26 : vector<8x128xf32>
    %28 = math.exp %27 : vector<8x128xf32>
    %cst_11 = arith.constant 1.000000e+00 : f32
    %29 = vector.broadcast %cst_11 : f32 to vector<8x128xf32>
    %30 = arith.addf %29, %28 : vector<8x128xf32>
    %31 = arith.divf %29, %30 : vector<8x128xf32>
    %32 = arith.mulf %23, %4 : vector<8x128xf32>
    %33 = arith.mulf %17, %25 : vector<8x128xf32>
    %34 = arith.addf %32, %33 : vector<8x128xf32>
    %35 = math.tanh %34 : vector<8x128xf32>
    %36 = arith.mulf %31, %35 : vector<8x128xf32>
    %37 = arith.index_cast %c0_i32_4 : i32 to index
    %c0_12 = arith.constant 0 : index
    %c0_13 = arith.constant 0 : index
    %38 = vector.load %arg5[%37, %c0_12, %c0_13] : memref<8x8x128xf32, #tpu.memory_space<vmem>>, vector<1x8x128xf32>
    %39 = vector.shape_cast %38 : vector<1x8x128xf32> to vector<8x128xf32>
    %40 = vector.shape_cast %36 : vector<8x128xf32> to vector<1x8x128xf32>
    tpu.vector_store %arg5[%37, %c0_12, %c0_13], %40 {strides = array<i32>} : memref<8x8x128xf32, #tpu.memory_space<vmem>>, vector<1x8x128xf32>,
    %c1_i32 = arith.constant 1 : i32
    %41 = arith.index_cast %c1_i32 : i32 to index
    %c0_14 = arith.constant 0 : index
    %c0_15 = arith.constant 0 : index
    %42 = vector.load %arg1[%41, %c0_14, %c0_15] : memref<8x8x512xf32, #tpu.memory_space<vmem>>, vector<1x8x512xf32>
    %43 = vector.shape_cast %42 : vector<1x8x512xf32> to vector<8x512xf32>
    %44 = arith.truncf %36 : vector<8x128xf32> to vector<8x128xbf16>
    %c0_16 = arith.constant 0 : index
    %c0_17 = arith.constant 0 : index
    %45 = vector.load %arg4[%c0_16, %c0_17] : memref<128x512xbf16, #tpu.memory_space<vmem>>, vector<128x512xbf16>
    %cst_18 = arith.constant dense<0.000000e+00> : vector<8x512xf32>
    %46 = tpu.matmul %44, %45, %cst_18 {dimension_numbers = #tpu.dot_dimension_numbers<[1], [0], [0], [1], [0, 0, 1, 1], [], []>} : vector<8x128xbf16>, vector<128x512xbf16>, vector<8x512xf32> -> vector<8x512xf32>
    %47 = arith.addf %43, %46 : vector<8x512xf32>
    %48 = vector.extract_strided_slice %47 {offsets = [0, 0], sizes = [8, 128], strides = [1, 1]} : vector<8x512xf32> to vector<8x128xf32>
    %49 = arith.negf %48 : vector<8x128xf32>
    %50 = math.exp %49 : vector<8x128xf32>
    %cst_19 = arith.constant 1.000000e+00 : f32
    %51 = vector.broadcast %cst_19 : f32 to vector<8x128xf32>
    %52 = arith.addf %51, %50 : vector<8x128xf32>
    %53 = arith.divf %51, %52 : vector<8x128xf32>
    %54 = vector.extract_strided_slice %47 {offsets = [0, 128], sizes = [8, 128], strides = [1, 1]} : vector<8x512xf32> to vector<8x128xf32>
    %55 = arith.negf %54 : vector<8x128xf32>
    %56 = math.exp %55 : vector<8x128xf32>
    %cst_20 = arith.constant 1.000000e+00 : f32
    %57 = vector.broadcast %cst_20 : f32 to vector<8x128xf32>
    %58 = arith.addf %57, %56 : vector<8x128xf32>
    %59 = arith.divf %57, %58 : vector<8x128xf32>
    %60 = vector.extract_strided_slice %47 {offsets = [0, 256], sizes = [8, 128], strides = [1, 1]} : vector<8x512xf32> to vector<8x128xf32>
    %61 = math.tanh %60 : vector<8x128xf32>
    %62 = vector.extract_strided_slice %47 {offsets = [0, 384], sizes = [8, 128], strides = [1, 1]} : vector<8x512xf32> to vector<8x128xf32>
    %63 = arith.negf %62 : vector<8x128xf32>
    %64 = math.exp %63 : vector<8x128xf32>
    %cst_21 = arith.constant 1.000000e+00 : f32
    %65 = vector.broadcast %cst_21 : f32 to vector<8x128xf32>
    %66 = arith.addf %65, %64 : vector<8x128xf32>
    %67 = arith.divf %65, %66 : vector<8x128xf32>
    %68 = arith.mulf %59, %34 : vector<8x128xf32>
    %69 = arith.mulf %53, %61 : vector<8x128xf32>
    %70 = arith.addf %68, %69 : vector<8x128xf32>
    %71 = math.tanh %70 : vector<8x128xf32>
    %72 = arith.mulf %67, %71 : vector<8x128xf32>
    %73 = arith.index_cast %c1_i32 : i32 to index
    %c0_22 = arith.constant 0 : index
    %c0_23 = arith.constant 0 : index
    %74 = vector.load %arg5[%73, %c0_22, %c0_23] : memref<8x8x128xf32, #tpu.memory_space<vmem>>, vector<1x8x128xf32>
    %75 = vector.shape_cast %74 : vector<1x8x128xf32> to vector<8x128xf32>
    %76 = vector.shape_cast %72 : vector<8x128xf32> to vector<1x8x128xf32>
    tpu.vector_store %arg5[%73, %c0_22, %c0_23], %76 {strides = array<i32>} : memref<8x8x128xf32, #tpu.memory_space<vmem>>, vector<1x8x128xf32>,
    %c2_i32 = arith.constant 2 : i32
    %77 = arith.index_cast %c2_i32 : i32 to index
    %c0_24 = arith.constant 0 : index
    %c0_25 = arith.constant 0 : index
    %78 = vector.load %arg1[%77, %c0_24, %c0_25] : memref<8x8x512xf32, #tpu.memory_space<vmem>>, vector<1x8x512xf32>
    %79 = vector.shape_cast %78 : vector<1x8x512xf32> to vector<8x512xf32>
    %80 = arith.truncf %72 : vector<8x128xf32> to vector<8x128xbf16>
    %c0_26 = arith.constant 0 : index
    %c0_27 = arith.constant 0 : index
    %81 = vector.load %arg4[%c0_26, %c0_27] : memref<128x512xbf16, #tpu.memory_space<vmem>>, vector<128x512xbf16>
    %cst_28 = arith.constant dense<0.000000e+00> : vector<8x512xf32>
    %82 = tpu.matmul %80, %81, %cst_28 {dimension_numbers = #tpu.dot_dimension_numbers<[1], [0], [0], [1], [0, 0, 1, 1], [], []>} : vector<8x128xbf16>, vector<128x512xbf16>, vector<8x512xf32> -> vector<8x512xf32>
    %83 = arith.addf %79, %82 : vector<8x512xf32>
    %84 = vector.extract_strided_slice %83 {offsets = [0, 0], sizes = [8, 128], strides = [1, 1]} : vector<8x512xf32> to vector<8x128xf32>
    %85 = arith.negf %84 : vector<8x128xf32>
    %86 = math.exp %85 : vector<8x128xf32>
    %cst_29 = arith.constant 1.000000e+00 : f32
    %87 = vector.broadcast %cst_29 : f32 to vector<8x128xf32>
    %88 = arith.addf %87, %86 : vector<8x128xf32>
    %89 = arith.divf %87, %88 : vector<8x128xf32>
    %90 = vector.extract_strided_slice %83 {offsets = [0, 128], sizes = [8, 128], strides = [1, 1]} : vector<8x512xf32> to vector<8x128xf32>
    %91 = arith.negf %90 : vector<8x128xf32>
    %92 = math.exp %91 : vector<8x128xf32>
    %cst_30 = arith.constant 1.000000e+00 : f32
    %93 = vector.broadcast %cst_30 : f32 to vector<8x128xf32>
    %94 = arith.addf %93, %92 : vector<8x128xf32>
    %95 = arith.divf %93, %94 : vector<8x128xf32>
    %96 = vector.extract_strided_slice %83 {offsets = [0, 256], sizes = [8, 128], strides = [1, 1]} : vector<8x512xf32> to vector<8x128xf32>
    %97 = math.tanh %96 : vector<8x128xf32>
    %98 = vector.extract_strided_slice %83 {offsets = [0, 384], sizes = [8, 128], strides = [1, 1]} : vector<8x512xf32> to vector<8x128xf32>
    %99 = arith.negf %98 : vector<8x128xf32>
    %100 = math.exp %99 : vector<8x128xf32>
    %cst_31 = arith.constant 1.000000e+00 : f32
    %101 = vector.broadcast %cst_31 : f32 to vector<8x128xf32>
    %102 = arith.addf %101, %100 : vector<8x128xf32>
    %103 = arith.divf %101, %102 : vector<8x128xf32>
    %104 = arith.mulf %95, %70 : vector<8x128xf32>
    %105 = arith.mulf %89, %97 : vector<8x128xf32>
    %106 = arith.addf %104, %105 : vector<8x128xf32>
    %107 = math.tanh %106 : vector<8x128xf32>
    %108 = arith.mulf %103, %107 : vector<8x128xf32>
    %109 = arith.index_cast %c2_i32 : i32 to index
    %c0_32 = arith.constant 0 : index
    %c0_33 = arith.constant 0 : index
    %110 = vector.load %arg5[%109, %c0_32, %c0_33] : memref<8x8x128xf32, #tpu.memory_space<vmem>>, vector<1x8x128xf32>
    %111 = vector.shape_cast %110 : vector<1x8x128xf32> to vector<8x128xf32>
    %112 = vector.shape_cast %108 : vector<8x128xf32> to vector<1x8x128xf32>
    tpu.vector_store %arg5[%109, %c0_32, %c0_33], %112 {strides = array<i32>} : memref<8x8x128xf32, #tpu.memory_space<vmem>>, vector<1x8x128xf32>,
    %c3_i32 = arith.constant 3 : i32
    %113 = arith.index_cast %c3_i32 : i32 to index
    %c0_34 = arith.constant 0 : index
    %c0_35 = arith.constant 0 : index
    %114 = vector.load %arg1[%113, %c0_34, %c0_35] : memref<8x8x512xf32, #tpu.memory_space<vmem>>, vector<1x8x512xf32>
    %115 = vector.shape_cast %114 : vector<1x8x512xf32> to vector<8x512xf32>
    %116 = arith.truncf %108 : vector<8x128xf32> to vector<8x128xbf16>
    %c0_36 = arith.constant 0 : index
    %c0_37 = arith.constant 0 : index
    %117 = vector.load %arg4[%c0_36, %c0_37] : memref<128x512xbf16, #tpu.memory_space<vmem>>, vector<128x512xbf16>
    %cst_38 = arith.constant dense<0.000000e+00> : vector<8x512xf32>
    %118 = tpu.matmul %116, %117, %cst_38 {dimension_numbers = #tpu.dot_dimension_numbers<[1], [0], [0], [1], [0, 0, 1, 1], [], []>} : vector<8x128xbf16>, vector<128x512xbf16>, vector<8x512xf32> -> vector<8x512xf32>
    %119 = arith.addf %115, %118 : vector<8x512xf32>
    %120 = vector.extract_strided_slice %119 {offsets = [0, 0], sizes = [8, 128], strides = [1, 1]} : vector<8x512xf32> to vector<8x128xf32>
    %121 = arith.negf %120 : vector<8x128xf32>
    %122 = math.exp %121 : vector<8x128xf32>
    %cst_39 = arith.constant 1.000000e+00 : f32
    %123 = vector.broadcast %cst_39 : f32 to vector<8x128xf32>
    %124 = arith.addf %123, %122 : vector<8x128xf32>
    %125 = arith.divf %123, %124 : vector<8x128xf32>
    %126 = vector.extract_strided_slice %119 {offsets = [0, 128], sizes = [8, 128], strides = [1, 1]} : vector<8x512xf32> to vector<8x128xf32>
    %127 = arith.negf %126 : vector<8x128xf32>
    %128 = math.exp %127 : vector<8x128xf32>
    %cst_40 = arith.constant 1.000000e+00 : f32
    %129 = vector.broadcast %cst_40 : f32 to vector<8x128xf32>
    %130 = arith.addf %129, %128 : vector<8x128xf32>
    %131 = arith.divf %129, %130 : vector<8x128xf32>
    %132 = vector.extract_strided_slice %119 {offsets = [0, 256], sizes = [8, 128], strides = [1, 1]} : vector<8x512xf32> to vector<8x128xf32>
    %133 = math.tanh %132 : vector<8x128xf32>
    %134 = vector.extract_strided_slice %119 {offsets = [0, 384], sizes = [8, 128], strides = [1, 1]} : vector<8x512xf32> to vector<8x128xf32>
    %135 = arith.negf %134 : vector<8x128xf32>
    %136 = math.exp %135 : vector<8x128xf32>
    %cst_41 = arith.constant 1.000000e+00 : f32
    %137 = vector.broadcast %cst_41 : f32 to vector<8x128xf32>
    %138 = arith.addf %137, %136 : vector<8x128xf32>
    %139 = arith.divf %137, %138 : vector<8x128xf32>
    %140 = arith.mulf %131, %106 : vector<8x128xf32>
    %141 = arith.mulf %125, %133 : vector<8x128xf32>
    %142 = arith.addf %140, %141 : vector<8x128xf32>
    %143 = math.tanh %142 : vector<8x128xf32>
    %144 = arith.mulf %139, %143 : vector<8x128xf32>
    %145 = arith.index_cast %c3_i32 : i32 to index
    %c0_42 = arith.constant 0 : index
    %c0_43 = arith.constant 0 : index
    %146 = vector.load %arg5[%145, %c0_42, %c0_43] : memref<8x8x128xf32, #tpu.memory_space<vmem>>, vector<1x8x128xf32>
    %147 = vector.shape_cast %146 : vector<1x8x128xf32> to vector<8x128xf32>
    %148 = vector.shape_cast %144 : vector<8x128xf32> to vector<1x8x128xf32>
    tpu.vector_store %arg5[%145, %c0_42, %c0_43], %148 {strides = array<i32>} : memref<8x8x128xf32, #tpu.memory_space<vmem>>, vector<1x8x128xf32>,
    %c4_i32 = arith.constant 4 : i32
    %149 = arith.index_cast %c4_i32 : i32 to index
    %c0_44 = arith.constant 0 : index
    %c0_45 = arith.constant 0 : index
    %150 = vector.load %arg1[%149, %c0_44, %c0_45] : memref<8x8x512xf32, #tpu.memory_space<vmem>>, vector<1x8x512xf32>
    %151 = vector.shape_cast %150 : vector<1x8x512xf32> to vector<8x512xf32>
    %152 = arith.truncf %144 : vector<8x128xf32> to vector<8x128xbf16>
    %c0_46 = arith.constant 0 : index
    %c0_47 = arith.constant 0 : index
    %153 = vector.load %arg4[%c0_46, %c0_47] : memref<128x512xbf16, #tpu.memory_space<vmem>>, vector<128x512xbf16>
    %cst_48 = arith.constant dense<0.000000e+00> : vector<8x512xf32>
    %154 = tpu.matmul %152, %153, %cst_48 {dimension_numbers = #tpu.dot_dimension_numbers<[1], [0], [0], [1], [0, 0, 1, 1], [], []>} : vector<8x128xbf16>, vector<128x512xbf16>, vector<8x512xf32> -> vector<8x512xf32>
    %155 = arith.addf %151, %154 : vector<8x512xf32>
    %156 = vector.extract_strided_slice %155 {offsets = [0, 0], sizes = [8, 128], strides = [1, 1]} : vector<8x512xf32> to vector<8x128xf32>
    %157 = arith.negf %156 : vector<8x128xf32>
    %158 = math.exp %157 : vector<8x128xf32>
    %cst_49 = arith.constant 1.000000e+00 : f32
    %159 = vector.broadcast %cst_49 : f32 to vector<8x128xf32>
    %160 = arith.addf %159, %158 : vector<8x128xf32>
    %161 = arith.divf %159, %160 : vector<8x128xf32>
    %162 = vector.extract_strided_slice %155 {offsets = [0, 128], sizes = [8, 128], strides = [1, 1]} : vector<8x512xf32> to vector<8x128xf32>
    %163 = arith.negf %162 : vector<8x128xf32>
    %164 = math.exp %163 : vector<8x128xf32>
    %cst_50 = arith.constant 1.000000e+00 : f32
    %165 = vector.broadcast %cst_50 : f32 to vector<8x128xf32>
    %166 = arith.addf %165, %164 : vector<8x128xf32>
    %167 = arith.divf %165, %166 : vector<8x128xf32>
    %168 = vector.extract_strided_slice %155 {offsets = [0, 256], sizes = [8, 128], strides = [1, 1]} : vector<8x512xf32> to vector<8x128xf32>
    %169 = math.tanh %168 : vector<8x128xf32>
    %170 = vector.extract_strided_slice %155 {offsets = [0, 384], sizes = [8, 128], strides = [1, 1]} : vector<8x512xf32> to vector<8x128xf32>
    %171 = arith.negf %170 : vector<8x128xf32>
    %172 = math.exp %171 : vector<8x128xf32>
    %cst_51 = arith.constant 1.000000e+00 : f32
    %173 = vector.broadcast %cst_51 : f32 to vector<8x128xf32>
    %174 = arith.addf %173, %172 : vector<8x128xf32>
    %175 = arith.divf %173, %174 : vector<8x128xf32>
    %176 = arith.mulf %167, %142 : vector<8x128xf32>
    %177 = arith.mulf %161, %169 : vector<8x128xf32>
    %178 = arith.addf %176, %177 : vector<8x128xf32>
    %179 = math.tanh %178 : vector<8x128xf32>
    %180 = arith.mulf %175, %179 : vector<8x128xf32>
    %181 = arith.index_cast %c4_i32 : i32 to index
    %c0_52 = arith.constant 0 : index
    %c0_53 = arith.constant 0 : index
    %182 = vector.load %arg5[%181, %c0_52, %c0_53] : memref<8x8x128xf32, #tpu.memory_space<vmem>>, vector<1x8x128xf32>
    %183 = vector.shape_cast %182 : vector<1x8x128xf32> to vector<8x128xf32>
    %184 = vector.shape_cast %180 : vector<8x128xf32> to vector<1x8x128xf32>
    tpu.vector_store %arg5[%181, %c0_52, %c0_53], %184 {strides = array<i32>} : memref<8x8x128xf32, #tpu.memory_space<vmem>>, vector<1x8x128xf32>,
    %c5_i32 = arith.constant 5 : i32
    %185 = arith.index_cast %c5_i32 : i32 to index
    %c0_54 = arith.constant 0 : index
    %c0_55 = arith.constant 0 : index
    %186 = vector.load %arg1[%185, %c0_54, %c0_55] : memref<8x8x512xf32, #tpu.memory_space<vmem>>, vector<1x8x512xf32>
    %187 = vector.shape_cast %186 : vector<1x8x512xf32> to vector<8x512xf32>
    %188 = arith.truncf %180 : vector<8x128xf32> to vector<8x128xbf16>
    %c0_56 = arith.constant 0 : index
    %c0_57 = arith.constant 0 : index
    %189 = vector.load %arg4[%c0_56, %c0_57] : memref<128x512xbf16, #tpu.memory_space<vmem>>, vector<128x512xbf16>
    %cst_58 = arith.constant dense<0.000000e+00> : vector<8x512xf32>
    %190 = tpu.matmul %188, %189, %cst_58 {dimension_numbers = #tpu.dot_dimension_numbers<[1], [0], [0], [1], [0, 0, 1, 1], [], []>} : vector<8x128xbf16>, vector<128x512xbf16>, vector<8x512xf32> -> vector<8x512xf32>
    %191 = arith.addf %187, %190 : vector<8x512xf32>
    %192 = vector.extract_strided_slice %191 {offsets = [0, 0], sizes = [8, 128], strides = [1, 1]} : vector<8x512xf32> to vector<8x128xf32>
    %193 = arith.negf %192 : vector<8x128xf32>
    %194 = math.exp %193 : vector<8x128xf32>
    %cst_59 = arith.constant 1.000000e+00 : f32
    %195 = vector.broadcast %cst_59 : f32 to vector<8x128xf32>
    %196 = arith.addf %195, %194 : vector<8x128xf32>
    %197 = arith.divf %195, %196 : vector<8x128xf32>
    %198 = vector.extract_strided_slice %191 {offsets = [0, 128], sizes = [8, 128], strides = [1, 1]} : vector<8x512xf32> to vector<8x128xf32>
    %199 = arith.negf %198 : vector<8x128xf32>
    %200 = math.exp %199 : vector<8x128xf32>
    %cst_60 = arith.constant 1.000000e+00 : f32
    %201 = vector.broadcast %cst_60 : f32 to vector<8x128xf32>
    %202 = arith.addf %201, %200 : vector<8x128xf32>
    %203 = arith.divf %201, %202 : vector<8x128xf32>
    %204 = vector.extract_strided_slice %191 {offsets = [0, 256], sizes = [8, 128], strides = [1, 1]} : vector<8x512xf32> to vector<8x128xf32>
    %205 = math.tanh %204 : vector<8x128xf32>
    %206 = vector.extract_strided_slice %191 {offsets = [0, 384], sizes = [8, 128], strides = [1, 1]} : vector<8x512xf32> to vector<8x128xf32>
    %207 = arith.negf %206 : vector<8x128xf32>
    %208 = math.exp %207 : vector<8x128xf32>
    %cst_61 = arith.constant 1.000000e+00 : f32
    %209 = vector.broadcast %cst_61 : f32 to vector<8x128xf32>
    %210 = arith.addf %209, %208 : vector<8x128xf32>
    %211 = arith.divf %209, %210 : vector<8x128xf32>
    %212 = arith.mulf %203, %178 : vector<8x128xf32>
    %213 = arith.mulf %197, %205 : vector<8x128xf32>
    %214 = arith.addf %212, %213 : vector<8x128xf32>
    %215 = math.tanh %214 : vector<8x128xf32>
    %216 = arith.mulf %211, %215 : vector<8x128xf32>
    %217 = arith.index_cast %c5_i32 : i32 to index
    %c0_62 = arith.constant 0 : index
    %c0_63 = arith.constant 0 : index
    %218 = vector.load %arg5[%217, %c0_62, %c0_63] : memref<8x8x128xf32, #tpu.memory_space<vmem>>, vector<1x8x128xf32>
    %219 = vector.shape_cast %218 : vector<1x8x128xf32> to vector<8x128xf32>
    %220 = vector.shape_cast %216 : vector<8x128xf32> to vector<1x8x128xf32>
    tpu.vector_store %arg5[%217, %c0_62, %c0_63], %220 {strides = array<i32>} : memref<8x8x128xf32, #tpu.memory_space<vmem>>, vector<1x8x128xf32>,
    %c6_i32 = arith.constant 6 : i32
    %221 = arith.index_cast %c6_i32 : i32 to index
    %c0_64 = arith.constant 0 : index
    %c0_65 = arith.constant 0 : index
    %222 = vector.load %arg1[%221, %c0_64, %c0_65] : memref<8x8x512xf32, #tpu.memory_space<vmem>>, vector<1x8x512xf32>
    %223 = vector.shape_cast %222 : vector<1x8x512xf32> to vector<8x512xf32>
    %224 = arith.truncf %216 : vector<8x128xf32> to vector<8x128xbf16>
    %c0_66 = arith.constant 0 : index
    %c0_67 = arith.constant 0 : index
    %225 = vector.load %arg4[%c0_66, %c0_67] : memref<128x512xbf16, #tpu.memory_space<vmem>>, vector<128x512xbf16>
    %cst_68 = arith.constant dense<0.000000e+00> : vector<8x512xf32>
    %226 = tpu.matmul %224, %225, %cst_68 {dimension_numbers = #tpu.dot_dimension_numbers<[1], [0], [0], [1], [0, 0, 1, 1], [], []>} : vector<8x128xbf16>, vector<128x512xbf16>, vector<8x512xf32> -> vector<8x512xf32>
    %227 = arith.addf %223, %226 : vector<8x512xf32>
    %228 = vector.extract_strided_slice %227 {offsets = [0, 0], sizes = [8, 128], strides = [1, 1]} : vector<8x512xf32> to vector<8x128xf32>
    %229 = arith.negf %228 : vector<8x128xf32>
    %230 = math.exp %229 : vector<8x128xf32>
    %cst_69 = arith.constant 1.000000e+00 : f32
    %231 = vector.broadcast %cst_69 : f32 to vector<8x128xf32>
    %232 = arith.addf %231, %230 : vector<8x128xf32>
    %233 = arith.divf %231, %232 : vector<8x128xf32>
    %234 = vector.extract_strided_slice %227 {offsets = [0, 128], sizes = [8, 128], strides = [1, 1]} : vector<8x512xf32> to vector<8x128xf32>
    %235 = arith.negf %234 : vector<8x128xf32>
    %236 = math.exp %235 : vector<8x128xf32>
    %cst_70 = arith.constant 1.000000e+00 : f32
    %237 = vector.broadcast %cst_70 : f32 to vector<8x128xf32>
    %238 = arith.addf %237, %236 : vector<8x128xf32>
    %239 = arith.divf %237, %238 : vector<8x128xf32>
    %240 = vector.extract_strided_slice %227 {offsets = [0, 256], sizes = [8, 128], strides = [1, 1]} : vector<8x512xf32> to vector<8x128xf32>
    %241 = math.tanh %240 : vector<8x128xf32>
    %242 = vector.extract_strided_slice %227 {offsets = [0, 384], sizes = [8, 128], strides = [1, 1]} : vector<8x512xf32> to vector<8x128xf32>
    %243 = arith.negf %242 : vector<8x128xf32>
    %244 = math.exp %243 : vector<8x128xf32>
    %cst_71 = arith.constant 1.000000e+00 : f32
    %245 = vector.broadcast %cst_71 : f32 to vector<8x128xf32>
    %246 = arith.addf %245, %244 : vector<8x128xf32>
    %247 = arith.divf %245, %246 : vector<8x128xf32>
    %248 = arith.mulf %239, %214 : vector<8x128xf32>
    %249 = arith.mulf %233, %241 : vector<8x128xf32>
    %250 = arith.addf %248, %249 : vector<8x128xf32>
    %251 = math.tanh %250 : vector<8x128xf32>
    %252 = arith.mulf %247, %251 : vector<8x128xf32>
    %253 = arith.index_cast %c6_i32 : i32 to index
    %c0_72 = arith.constant 0 : index
    %c0_73 = arith.constant 0 : index
    %254 = vector.load %arg5[%253, %c0_72, %c0_73] : memref<8x8x128xf32, #tpu.memory_space<vmem>>, vector<1x8x128xf32>
    %255 = vector.shape_cast %254 : vector<1x8x128xf32> to vector<8x128xf32>
    %256 = vector.shape_cast %252 : vector<8x128xf32> to vector<1x8x128xf32>
    tpu.vector_store %arg5[%253, %c0_72, %c0_73], %256 {strides = array<i32>} : memref<8x8x128xf32, #tpu.memory_space<vmem>>, vector<1x8x128xf32>,
    %c7_i32 = arith.constant 7 : i32
    %257 = arith.index_cast %c7_i32 : i32 to index
    %c0_74 = arith.constant 0 : index
    %c0_75 = arith.constant 0 : index
    %258 = vector.load %arg1[%257, %c0_74, %c0_75] : memref<8x8x512xf32, #tpu.memory_space<vmem>>, vector<1x8x512xf32>
    %259 = vector.shape_cast %258 : vector<1x8x512xf32> to vector<8x512xf32>
    %260 = arith.truncf %252 : vector<8x128xf32> to vector<8x128xbf16>
    %c0_76 = arith.constant 0 : index
    %c0_77 = arith.constant 0 : index
    %261 = vector.load %arg4[%c0_76, %c0_77] : memref<128x512xbf16, #tpu.memory_space<vmem>>, vector<128x512xbf16>
    %cst_78 = arith.constant dense<0.000000e+00> : vector<8x512xf32>
    %262 = tpu.matmul %260, %261, %cst_78 {dimension_numbers = #tpu.dot_dimension_numbers<[1], [0], [0], [1], [0, 0, 1, 1], [], []>} : vector<8x128xbf16>, vector<128x512xbf16>, vector<8x512xf32> -> vector<8x512xf32>
    %263 = arith.addf %259, %262 : vector<8x512xf32>
    %264 = vector.extract_strided_slice %263 {offsets = [0, 0], sizes = [8, 128], strides = [1, 1]} : vector<8x512xf32> to vector<8x128xf32>
    %265 = arith.negf %264 : vector<8x128xf32>
    %266 = math.exp %265 : vector<8x128xf32>
    %cst_79 = arith.constant 1.000000e+00 : f32
    %267 = vector.broadcast %cst_79 : f32 to vector<8x128xf32>
    %268 = arith.addf %267, %266 : vector<8x128xf32>
    %269 = arith.divf %267, %268 : vector<8x128xf32>
    %270 = vector.extract_strided_slice %263 {offsets = [0, 128], sizes = [8, 128], strides = [1, 1]} : vector<8x512xf32> to vector<8x128xf32>
    %271 = arith.negf %270 : vector<8x128xf32>
    %272 = math.exp %271 : vector<8x128xf32>
    %cst_80 = arith.constant 1.000000e+00 : f32
    %273 = vector.broadcast %cst_80 : f32 to vector<8x128xf32>
    %274 = arith.addf %273, %272 : vector<8x128xf32>
    %275 = arith.divf %273, %274 : vector<8x128xf32>
    %276 = vector.extract_strided_slice %263 {offsets = [0, 256], sizes = [8, 128], strides = [1, 1]} : vector<8x512xf32> to vector<8x128xf32>
    %277 = math.tanh %276 : vector<8x128xf32>
    %278 = vector.extract_strided_slice %263 {offsets = [0, 384], sizes = [8, 128], strides = [1, 1]} : vector<8x512xf32> to vector<8x128xf32>
    %279 = arith.negf %278 : vector<8x128xf32>
    %280 = math.exp %279 : vector<8x128xf32>
    %cst_81 = arith.constant 1.000000e+00 : f32
    %281 = vector.broadcast %cst_81 : f32 to vector<8x128xf32>
    %282 = arith.addf %281, %280 : vector<8x128xf32>
    %283 = arith.divf %281, %282 : vector<8x128xf32>
    %284 = arith.mulf %275, %250 : vector<8x128xf32>
    %285 = arith.mulf %269, %277 : vector<8x128xf32>
    %286 = arith.addf %284, %285 : vector<8x128xf32>
    %287 = math.tanh %286 : vector<8x128xf32>
    %288 = arith.mulf %283, %287 : vector<8x128xf32>
    %289 = arith.index_cast %c7_i32 : i32 to index
    %c0_82 = arith.constant 0 : index
    %c0_83 = arith.constant 0 : index
    %290 = vector.load %arg5[%289, %c0_82, %c0_83] : memref<8x8x128xf32, #tpu.memory_space<vmem>>, vector<1x8x128xf32>
    %291 = vector.shape_cast %290 : vector<1x8x128xf32> to vector<8x128xf32>
    %292 = vector.shape_cast %288 : vector<8x128xf32> to vector<1x8x128xf32>
    tpu.vector_store %arg5[%289, %c0_82, %c0_83], %292 {strides = array<i32>} : memref<8x8x128xf32, #tpu.memory_space<vmem>>, vector<1x8x128xf32>,
    %c8_i32 = arith.constant 8 : i32
    %c0_84 = arith.constant 0 : index
    %c0_85 = arith.constant 0 : index
    %293 = vector.load %arg8[%c0_84, %c0_85] : memref<8x128xf32, #tpu.memory_space<vmem>>, vector<8x128xf32>
    tpu.vector_store %arg8[%c0_84, %c0_85], %288 {strides = array<i32>} : memref<8x128xf32, #tpu.memory_space<vmem>>, vector<8x128xf32>,
    %c0_86 = arith.constant 0 : index
    %c0_87 = arith.constant 0 : index
    %294 = vector.load %arg9[%c0_86, %c0_87] : memref<8x128xf32, #tpu.memory_space<vmem>>, vector<8x128xf32>
    tpu.vector_store %arg9[%c0_86, %c0_87], %286 {strides = array<i32>} : memref<8x128xf32, #tpu.memory_space<vmem>>, vector<8x128xf32>,
    %c0_i32_88 = arith.constant 0 : i32
    %295 = arith.cmpi eq, %arg0, %c0_i32_88 : i32
    %296 = arith.extui %295 : i1 to i32
    %c0_i32_89 = arith.constant 0 : i32
    %297 = arith.cmpi ne, %296, %c0_i32_89 : i32
    scf.if %297 {
      %c0_90 = arith.constant 0 : index
      %c0_91 = arith.constant 0 : index
      %298 = vector.load %arg6[%c0_90, %c0_91] : memref<8x128xf32, #tpu.memory_space<vmem>>, vector<8x128xf32>
      tpu.vector_store %arg6[%c0_90, %c0_91], %288 {strides = array<i32>} : memref<8x128xf32, #tpu.memory_space<vmem>>, vector<8x128xf32>,
      %c0_92 = arith.constant 0 : index
      %c0_93 = arith.constant 0 : index
      %299 = vector.load %arg7[%c0_92, %c0_93] : memref<8x128xf32, #tpu.memory_space<vmem>>, vector<8x128xf32>
      tpu.vector_store %arg7[%c0_92, %c0_93], %286 {strides = array<i32>} : memref<8x128xf32, #tpu.memory_space<vmem>>, vector<8x128xf32>,
    } else {
    }
    return
  }
  func.func @transform_0(%arg0: i32) -> (i32, i32, i32) {
    %c0_i32 = arith.constant 0 : i32
    %c0_i32_0 = arith.constant 0 : i32
    %c0_i32_1 = arith.constant 0 : i32
    return %arg0, %c0_i32, %c0_i32_0 : i32, i32, i32
  }
  func.func @transform_1(%arg0: i32) -> (i32, i32) {
    %c0_i32 = arith.constant 0 : i32
    %c0_i32_0 = arith.constant 0 : i32
    %c0_i32_1 = arith.constant 0 : i32
    return %c0_i32, %c0_i32_0 : i32, i32
  }
  func.func @transform_2(%arg0: i32) -> (i32, i32) {
    %c0_i32 = arith.constant 0 : i32
    %c0_i32_0 = arith.constant 0 : i32
    %c0_i32_1 = arith.constant 0 : i32
    return %c0_i32, %c0_i32_0 : i32, i32
  }
  func.func @transform_3(%arg0: i32) -> (i32, i32) {
    %c0_i32 = arith.constant 0 : i32
    %c0_i32_0 = arith.constant 0 : i32
    %c0_i32_1 = arith.constant 0 : i32
    return %c0_i32, %c0_i32_0 : i32, i32
  }
  func.func @transform_4(%arg0: i32) -> (i32, i32, i32) {
    %c0_i32 = arith.constant 0 : i32
    %c0_i32_0 = arith.constant 0 : i32
    %c0_i32_1 = arith.constant 0 : i32
    return %arg0, %c0_i32, %c0_i32_0 : i32, i32, i32
  }
  func.func @transform_5(%arg0: i32) -> (i32, i32) {
    %c0_i32 = arith.constant 0 : i32
    %c0_i32_0 = arith.constant 0 : i32
    %c0_i32_1 = arith.constant 0 : i32
    return %c0_i32, %c0_i32_0 : i32, i32
  }
  func.func @transform_6(%arg0: i32) -> (i32, i32) {
    %c0_i32 = arith.constant 0 : i32
    %c0_i32_0 = arith.constant 0 : i32
    %c0_i32_1 = arith.constant 0 : i32
    return %c0_i32, %c0_i32_0 : i32, i32
  }
}

module attributes {stable_mosaic.version = 11 : i64} {
  func.func @_projection_kernel(%arg0: i32, %arg1: memref<64x128xf32, #tpu.memory_space<vmem>>, %arg2: memref<128x256xbf16, #tpu.memory_space<vmem>>, %arg3: memref<256x384xbf16, #tpu.memory_space<vmem>>, %arg4: memref<1x384xf32, #tpu.memory_space<vmem>>, %arg5: memref<64x256xf32, #tpu.memory_space<vmem>>, %arg6: memref<64x384xf32, #tpu.memory_space<vmem>>) attributes {dimension_semantics = [#tpu.dimension_semantics<parallel>], iteration_bounds = array<i64: 1>, scalar_prefetch = 0 : i64, scratch_operands = 0 : i64, tpu.core_type = #tpu.core_type<tc>, window_params = [{transform_indices = @transform_0, window_bounds = array<i64: 64, 128>}, {pipeline_mode = #tpu.pipeline_mode<synchronous>, transform_indices = @transform_1, window_bounds = array<i64: 128, 256>}, {pipeline_mode = #tpu.pipeline_mode<synchronous>, transform_indices = @transform_2, window_bounds = array<i64: 256, 384>}, {pipeline_mode = #tpu.pipeline_mode<synchronous>, transform_indices = @transform_3, window_bounds = array<i64: 1, 384>}, {transform_indices = @transform_4, window_bounds = array<i64: 64, 256>}, {transform_indices = @transform_5, window_bounds = array<i64: 64, 384>}]} {
    %c0 = arith.constant 0 : index
    %c0_0 = arith.constant 0 : index
    %0 = vector.load %arg1[%c0, %c0_0] : memref<64x128xf32, #tpu.memory_space<vmem>>, vector<64x128xf32>
    %1 = arith.truncf %0 : vector<64x128xf32> to vector<64x128xbf16>
    %c0_1 = arith.constant 0 : index
    %c0_2 = arith.constant 0 : index
    %2 = vector.load %arg2[%c0_1, %c0_2] : memref<128x256xbf16, #tpu.memory_space<vmem>>, vector<128x256xbf16>
    %cst = arith.constant dense<0.000000e+00> : vector<64x256xf32>
    %3 = tpu.matmul %1, %2, %cst {dimension_numbers = #tpu.dot_dimension_numbers<[1], [0], [0], [1], [0, 0, 1, 1], [], []>} : vector<64x128xbf16>, vector<128x256xbf16>, vector<64x256xf32> -> vector<64x256xf32>
    %c0_3 = arith.constant 0 : index
    %c0_4 = arith.constant 0 : index
    %4 = vector.load %arg5[%c0_3, %c0_4] : memref<64x256xf32, #tpu.memory_space<vmem>>, vector<64x256xf32>
    tpu.vector_store %arg5[%c0_3, %c0_4], %3 {strides = array<i32>} : memref<64x256xf32, #tpu.memory_space<vmem>>, vector<64x256xf32>,
    %5 = arith.truncf %3 : vector<64x256xf32> to vector<64x256xbf16>
    %c0_5 = arith.constant 0 : index
    %c0_6 = arith.constant 0 : index
    %6 = vector.load %arg3[%c0_5, %c0_6] : memref<256x384xbf16, #tpu.memory_space<vmem>>, vector<256x384xbf16>
    %cst_7 = arith.constant dense<0.000000e+00> : vector<64x384xf32>
    %7 = tpu.matmul %5, %6, %cst_7 {dimension_numbers = #tpu.dot_dimension_numbers<[1], [0], [0], [1], [0, 0, 1, 1], [], []>} : vector<64x256xbf16>, vector<256x384xbf16>, vector<64x384xf32> -> vector<64x384xf32>
    %c0_8 = arith.constant 0 : index
    %c0_9 = arith.constant 0 : index
    %8 = vector.load %arg4[%c0_8, %c0_9] : memref<1x384xf32, #tpu.memory_space<vmem>>, vector<1x384xf32>
    %9 = vector.broadcast %8 : vector<1x384xf32> to vector<64x384xf32>
    %10 = arith.addf %7, %9 : vector<64x384xf32>
    %11 = vector.extract_strided_slice %10 {offsets = [0, 0], sizes = [64, 256], strides = [1, 1]} : vector<64x384xf32> to vector<64x256xf32>
    %12 = vector.extract_strided_slice %10 {offsets = [0, 256], sizes = [64, 128], strides = [1, 1]} : vector<64x384xf32> to vector<64x128xf32>
    %cst_10 = arith.constant dense<0xFF800000> : vector<64xf32>
    %13 = vector.multi_reduction <maximumf>, %11, %cst_10 [1] : vector<64x256xf32> to vector<64xf32>
    %14 = vector.shape_cast %13 : vector<64xf32> to vector<64x1xf32>
    %15 = vector.broadcast %14 : vector<64x1xf32> to vector<64x256xf32>
    %16 = arith.subf %11, %15 : vector<64x256xf32>
    %cst_11 = arith.constant dense<0xFF800000> : vector<64xf32>
    %17 = vector.multi_reduction <maximumf>, %12, %cst_11 [1] : vector<64x128xf32> to vector<64xf32>
    %18 = vector.shape_cast %17 : vector<64xf32> to vector<64x1xf32>
    %19 = vector.broadcast %18 : vector<64x1xf32> to vector<64x128xf32>
    %20 = arith.subf %12, %19 : vector<64x128xf32>
    %21 = math.exp %16 : vector<64x256xf32>
    %cst_12 = arith.constant dense<0.000000e+00> : vector<64xf32>
    %22 = vector.multi_reduction <add>, %21, %cst_12 [1] : vector<64x256xf32> to vector<64xf32>
    %23 = vector.shape_cast %22 : vector<64xf32> to vector<64x1xf32>
    %24 = math.log %23 : vector<64x1xf32>
    %25 = vector.broadcast %24 : vector<64x1xf32> to vector<64x256xf32>
    %26 = arith.subf %16, %25 : vector<64x256xf32>
    %27 = math.exp %20 : vector<64x128xf32>
    %cst_13 = arith.constant dense<0.000000e+00> : vector<64xf32>
    %28 = vector.multi_reduction <add>, %27, %cst_13 [1] : vector<64x128xf32> to vector<64xf32>
    %29 = vector.shape_cast %28 : vector<64xf32> to vector<64x1xf32>
    %30 = math.log %29 : vector<64x1xf32>
    %31 = vector.broadcast %30 : vector<64x1xf32> to vector<64x128xf32>
    %32 = arith.subf %20, %31 : vector<64x128xf32>
    %33 = tpu.concatenate %26, %32 in 1 : vector<64x256xf32>, vector<64x128xf32> -> vector<64x384xf32>
    %c0_14 = arith.constant 0 : index
    %c0_15 = arith.constant 0 : index
    %34 = vector.load %arg6[%c0_14, %c0_15] : memref<64x384xf32, #tpu.memory_space<vmem>>, vector<64x384xf32>
    tpu.vector_store %arg6[%c0_14, %c0_15], %33 {strides = array<i32>} : memref<64x384xf32, #tpu.memory_space<vmem>>, vector<64x384xf32>,
    return
  }
  func.func @transform_0(%arg0: i32) -> (i32, i32) {
    %c0_i32 = arith.constant 0 : i32
    %c0_i32_0 = arith.constant 0 : i32
    return %arg0, %c0_i32 : i32, i32
  }
  func.func @transform_1(%arg0: i32) -> (i32, i32) {
    %c0_i32 = arith.constant 0 : i32
    %c0_i32_0 = arith.constant 0 : i32
    %c0_i32_1 = arith.constant 0 : i32
    return %c0_i32, %c0_i32_0 : i32, i32
  }
  func.func @transform_2(%arg0: i32) -> (i32, i32) {
    %c0_i32 = arith.constant 0 : i32
    %c0_i32_0 = arith.constant 0 : i32
    %c0_i32_1 = arith.constant 0 : i32
    return %c0_i32, %c0_i32_0 : i32, i32
  }
  func.func @transform_3(%arg0: i32) -> (i32, i32) {
    %c0_i32 = arith.constant 0 : i32
    %c0_i32_0 = arith.constant 0 : i32
    %c0_i32_1 = arith.constant 0 : i32
    return %c0_i32, %c0_i32_0 : i32, i32
  }
  func.func @transform_4(%arg0: i32) -> (i32, i32) {
    %c0_i32 = arith.constant 0 : i32
    %c0_i32_0 = arith.constant 0 : i32
    return %arg0, %c0_i32 : i32, i32
  }
  func.func @transform_5(%arg0: i32) -> (i32, i32) {
    %c0_i32 = arith.constant 0 : i32
    %c0_i32_0 = arith.constant 0 : i32
    return %arg0, %c0_i32 : i32, i32
  }
}

</mosaic_0001>

<bundles_post_ra>
// kernel: path_integration_sequence.3
= control target key start
LH: loop header
LB: loop body
LE: loop exit
PB: predicated region body
PF: predicated region fallthrough
CT: control target
= control target key end

     0   :  { %v1213_v1 = vmov 0   ;;  %s1809_s1 = inlined_call_operand.vmem [shape: bf16[128,256], index: 1, kind: input, shape index: {}]   ;;  %s1810_s2 = inlined_call_operand.vmem [shape: bf16[256,384], index: 2, kind: input, shape index: {}]   ;;  %s1811_s0 = inlined_call_operand.vmem [shape: f32[64,128], index: 0, kind: input, shape index: {}]   ;;  %s1812_s4 = inlined_call_operand.vmem [shape: f32[64,256], index: 4, kind: output, shape index: {0}]   ;;  %s1813_s3 = inlined_call_operand.vmem [shape: f32[1,384], index: 3, kind: input, shape index: {}]   ;;  %s1814_s5 = inlined_call_operand.vmem [shape: f32[64,384], index: 5, kind: output, shape index: {1}]  }
   0x1   :  { %v1045_v0 = vld [vmem:[%s1809_s1 + $0x4] ss:$8 sps:$4 sm:$0xff]   ;;  %160 = vmatprep.mubr.bf16.mxu0 %v1213_v1  ;;  %v1047_v2 = vld [vmem:[%s1809_s1] ss:$8 sps:$4 sm:$0xff]   ;;  %v1048_v3 = vld [vmem:[%s1809_s1 + $0x14] ss:$8 sps:$4 sm:$0xff]  }
   0x2   :  { %128 = vmatprep.subr.bf16.mxu0 %v1045_v0  ;;  %v1050_v4 = vld [vmem:[%s1809_s1 + $0x10] ss:$8 sps:$4 sm:$0xff]   ;;  %v1051_v5 = vld [vmem:[%s1809_s1 + $0x24] ss:$8 sps:$4 sm:$0xff]   ;;  %v1053_v6 = vld [vmem:[%s1809_s1 + $0x20] ss:$8 sps:$4 sm:$0xff]  }
   0x3   :  { %129 = vmatpush1.bf16.msra.mxu0 %v1047_v2  ;;  %v1054_v7 = vld [vmem:[%s1809_s1 + $0x34] ss:$8 sps:$4 sm:$0xff]   ;;  %v1056_v8 = vld [vmem:[%s1809_s1 + $0x30] ss:$8 sps:$4 sm:$0xff]   ;;  %v1057_v9 = vld [vmem:[%s1809_s1 + $0x44] ss:$8 sps:$4 sm:$0xff]  }
   0x4   :  { %130 = vmatprep.subr.bf16.mxu0 %v1048_v3  ;;  %v1069_v10 = vld [vmem:[%s1810_s2 + $0x4] ss:$12 sps:$4 sm:$0xff]   ;;  %v1071_v11 = vld [vmem:[%s1810_s2] ss:$12 sps:$4 sm:$0xff]   ;;  %v1072_v13 = vld [vmem:[%s1810_s2 + $0x1c] ss:$12 sps:$4 sm:$0xff]  }
   0x5   :  { %v1059_v12 = vld [vmem:[%s1809_s1 + $0x40] ss:$8 sps:$4 sm:$0xff]   ;;  %v1060_v14 = vld [vmem:[%s1809_s1 + $0x54] ss:$8 sps:$4 sm:$0xff]   ;;  %562 = vmatprep.subr.bf16.mxu1 %v1069_v10  ;;  %v1074_v15 = vld [vmem:[%s1810_s2 + $0x18] ss:$12 sps:$4 sm:$0xff]  }
   0x6   :  { %563 = vmatpush1.bf16.msra.mxu1 %v1071_v11  ;;  %v1075_v16 = vld [vmem:[%s1810_s2 + $0x34] ss:$12 sps:$4 sm:$0xff]   ;;  %v1062_v17 = vld [vmem:[%s1809_s1 + $0x50] ss:$8 sps:$4 sm:$0xff]   ;;  %v1063_v18 = vld [vmem:[%s1809_s1 + $0x64] ss:$8 sps:$4 sm:$0xff]  }
   0x7   :  { %131 = vmatpush1.bf16.msra.mxu0 %v1050_v4  ;;  %564 = vmatprep.subr.bf16.mxu1 %v1072_v13  ;;  %v1077_v19 = vld [vmem:[%s1810_s2 + $0x30] ss:$12 sps:$4 sm:$0xff]   ;;  %v1078_v20 = vld [vmem:[%s1810_s2 + $0x4c] ss:$12 sps:$4 sm:$0xff]   ;;  %v1065_v21 = vld [vmem:[%s1809_s1 + $0x60] ss:$8 sps:$4 sm:$0xff]  }
   0x8   :  { %132 = vmatprep.subr.bf16.mxu0 %v1051_v5  ;;  %v1066_v22 = vld [vmem:[%s1809_s1 + $0x74] ss:$8 sps:$4 sm:$0xff]   ;;  %v1068_v23 = vld [vmem:[%s1809_s1 + $0x70] ss:$8 sps:$4 sm:$0xff]   ;;  %v20_v24 = vld [vmem:[%s1811_s0] sm:$0xff] }
   0x9   :  { %v1080_v25 = vld [vmem:[%s1810_s2 + $0x48] ss:$12 sps:$4 sm:$0xff]   ;;  %v1081_v26 = vld [vmem:[%s1810_s2 + $0x64] ss:$12 sps:$4 sm:$0xff]   ;;  %v1083_v29 = vld [vmem:[%s1810_s2 + $0x60] ss:$12 sps:$4 sm:$0xff]  }
   0xa   :  { %565 = vmatpush1.bf16.msra.mxu1 %v1074_v15  ;;  %v21_v27 = vld [vmem:[%s1811_s0 + $0x8] sm:$0xff]  ;;  %v22_v34 = vld [vmem:[%s1811_s0 + $0x10] sm:$0xff]  ;;  %v23_v35 = vld [vmem:[%s1811_s0 + $0x18] sm:$0xff] }
   0xb   :  { %133 = vmatpush1.bf16.msra.mxu0 %v1053_v6  ;;  %566 = vmatprep.subr.bf16.mxu1 %v1075_v16  ;;  %v1095_v28 = vld [vmem:[%s1810_s2 + $0xc8] ss:$12 sps:$4 sm:$0xff]   ;;  %v28_v30 = vpack.c.bf16 %v21_v27, %v20_v24  ;;  %v1100_v33 = vld [vmem:[%s1810_s2 + $0xe0] ss:$12 sps:$4 sm:$0xff]   ;;  %v1086_v36 = vld [vmem:[%s1810_s2 + $0x78] ss:$12 sps:$4 sm:$0xff]   ;;  %v29_v41 = vpack.c.bf16 %v23_v35, %v22_v34 }
   0xc   :  { %134 = vmatprep.subr.bf16.mxu0 %v1054_v7  ;;  %v1084_v31 = vld [vmem:[%s1810_s2 + $0x7c] ss:$12 sps:$4 sm:$0xff]   ;;  %v1087_v37 = vld [vmem:[%s1810_s2 + $0x94] ss:$12 sps:$4 sm:$0xff]   ;;  %v1105_v39 = vld [vmem:[%s1810_s2 + $0xf8] ss:$12 sps:$4 sm:$0xff]  }
   0xd   :  { %v1097_v32 = vld [vmem:[%s1810_s2 + $0x8] ss:$12 sps:$4 sm:$0xff]   ;;  %v1102_v38 = vld [vmem:[%s1810_s2 + $0x20] ss:$12 sps:$4 sm:$0xff]   ;;  %v1089_v40 = vld [vmem:[%s1810_s2 + $0x90] ss:$12 sps:$4 sm:$0xff]  }
   0xe   :  { %567 = vmatpush1.bf16.msra.mxu1 %v1077_v19  ;;  %v1090_v42 = vld [vmem:[%s1810_s2 + $0xac] ss:$12 sps:$4 sm:$0xff]   ;;  %v1110_v44 = vld [vmem:[%s1810_s2 + $0x110] ss:$12 sps:$4 sm:$0xff]   ;;  %v24_v45 = vld [vmem:[%s1811_s0 + $0x20] sm:$0xff] }
   0xf   :  { %135 = vmatpush1.bf16.msra.mxu0 %v1056_v8  ;;  %568 = vmatprep.subr.bf16.mxu1 %v1078_v20  ;;  %v1107_v43 = vld [vmem:[%s1810_s2 + $0x38] ss:$12 sps:$4 sm:$0xff]   ;;  %v1092_v46 = vld [vmem:[%s1810_s2 + $0xa8] ss:$12 sps:$4 sm:$0xff]   ;;  %v1096_v49 = vld [vmem:[%s1810_s2 + $0xc0] ss:$12 sps:$4 sm:$0xff]  }
  0x10   :  { %136 = vmatprep.subr.bf16.mxu0 %v1057_v9  ;;  %v25_v47 = vld [vmem:[%s1811_s0 + $0x28] sm:$0xff]  ;;  %v1093_v48 = vld [vmem:[%s1810_s2 + $0xc4] ss:$12 sps:$4 sm:$0xff]   ;;  %v1103_v57 = vld [vmem:[%s1810_s2 + $0xf4] ss:$12 sps:$4 sm:$0xff]  }
  0x11   :  { %v1112_v50 = vld [vmem:[%s1810_s2 + $0x50] ss:$12 sps:$4 sm:$0xff]   ;;  %v1115_v52 = vld [vmem:[%s1810_s2 + $0x128] ss:$12 sps:$4 sm:$0xff]   ;;  %v30_v54 = vpack.c.bf16 %v25_v47, %v24_v45  ;;  %v1120_v55 = vld [vmem:[%s1810_s2 + $0x140] ss:$12 sps:$4 sm:$0xff]  }
  0x12   :  { %569 = vmatpush1.bf16.msra.mxu1 %v1080_v25  ;;  %v1098_v51 = vld [vmem:[%s1810_s2 + $0xdc] ss:$12 sps:$4 sm:$0xff]   ;;  %v1101_v56 = vld [vmem:[%s1810_s2 + $0xd8] ss:$12 sps:$4 sm:$0xff]   ;;  %v26_v58 = vld [vmem:[%s1811_s0 + $0x30] sm:$0xff] }
  0x13   :  { %137 = vmatpush1.bf16.msra.mxu0 %v1059_v12  ;;  %570 = vmatprep.subr.bf16.mxu1 %v1081_v26  ;;  %v1117_v53 = vld [vmem:[%s1810_s2 + $0x68] ss:$12 sps:$4 sm:$0xff]   ;;  %v27_v59 = vld [vmem:[%s1811_s0 + $0x38] sm:$0xff]  ;;  %v1122_v60 = vld [vmem:[%s1810_s2 + $0x80] ss:$12 sps:$4 sm:$0xff]  }
  0x14   :  { %138 = vmatprep.subr.bf16.mxu0 %v1060_v14  ;;  %v1125_v61 = vld [vmem:[%s1810_s2 + $0x158] ss:$12 sps:$4 sm:$0xff]   ;;  %v1106_v62 = vld [vmem:[%s1810_s2 + $0xf0] ss:$12 sps:$4 sm:$0xff]   ;;  %v31_v63 = vpack.c.bf16 %v27_v59, %v26_v58  ;;  %v1116_v3 = vld [vmem:[%s1810_s2 + $0x120] ss:$12 sps:$4 sm:$0xff]  }
  0x15   :  { %v1108_v0 = vld [vmem:[%s1810_s2 + $0x10c] ss:$12 sps:$4 sm:$0xff]   ;;  %v1113_v2 = vld [vmem:[%s1810_s2 + $0x124] ss:$12 sps:$4 sm:$0xff]   ;;  %v1118_v4 = vld [vmem:[%s1810_s2 + $0x13c] ss:$12 sps:$4 sm:$0xff]  }
  0x16   :  { %571 = vmatpush1.bf16.msra.mxu1 %v1083_v29  ;;  %v1121_v5 = vld [vmem:[%s1810_s2 + $0x138] ss:$12 sps:$4 sm:$0xff]   ;;  %v1123_v6 = vld [vmem:[%s1810_s2 + $0x154] ss:$12 sps:$4 sm:$0xff]   ;;  %v1126_v7 = vld [vmem:[%s1810_s2 + $0x150] ss:$12 sps:$4 sm:$0xff]  }
  0x17   :  { %139 = vmatpush1.bf16.msra.mxu0 %v1062_v17  ;;  %572 = vmatprep.subr.bf16.mxu1 %v1084_v31  ;;  %v1127_v8 = vld [vmem:[%s1810_s2 + $0x98] ss:$12 sps:$4 sm:$0xff]   ;;  %v1130_v10 = vld [vmem:[%s1810_s2 + $0x170] ss:$12 sps:$4 sm:$0xff]   ;;  %v1131_v11 = vld [vmem:[%s1810_s2 + $0x168] ss:$12 sps:$4 sm:$0xff]  }
  0x18   :  { %140 = vmatprep.subr.bf16.mxu0 %v1063_v18  ;;  %v1128_v9 = vld [vmem:[%s1810_s2 + $0x16c] ss:$12 sps:$4 sm:$0xff]   ;;  %v1132_v12 = vld [vmem:[%s1810_s2 + $0xb0] ss:$12 sps:$4 sm:$0xff]  }
  0x1a   :  { %573 = vmatpush1.bf16.msra.mxu1 %v1086_v36 }
  0x1b   :  { %141 = vmatpush1.bf16.msra.mxu0 %v1065_v21  ;;  %574 = vmatprep.subr.bf16.mxu1 %v1087_v37  ;;  %v291_v37 = vlaneseq }
  0x1c   :  { %142 = vmatprep.subr.bf16.mxu0 %v1066_v22 }
  0x1e   :  { %575 = vmatpush1.bf16.msra.mxu1 %v1089_v40  ;;  %v289_v40 = vld [vmem:[%s1813_s3] sm:$0x7] }
  0x1f   :  { %143 = vmatpush1.bf16.msra.mxu0 %v1068_v23  ;;  %576 = vmatprep.subr.bf16.mxu1 %v1090_v42 }
  0x20   :  { %1004 = vmatprep.subr.bf16.mxu0 %v1095_v28 }
  0x22   :  { %161 = vmatmul.mubr.bf16.vlgmr.msra.gmra.mrb[0].mxu0 %v28_v30  ;;  %577 = vmatpush1.bf16.msra.mxu1 %v1092_v46 }
  0x23   :  { %170 = vmatprep.mubr.bf16.mxu0 %v1213_v1  ;;  %1005 = vmatpush3.bf16.msra.mxu0 %v1097_v32 }
  0x24   :  { %1006 = vmatprep.subr.bf16.mxu0 %v1100_v33  ;;  %578 = vmatprep.subr.bf16.mxu1 %v1093_v48 }
  0x26   :  { %579 = vmatpush1.bf16.msra.mxu1 %v1096_v49 }
  0x27   :  { %1007 = vmatpush3.bf16.msra.mxu0 %v1102_v38  ;;  %580 = vmatprep.subr.bf16.mxu1 %v1098_v51  ;;  %v292_v38 = vshrl.u32 %v291_v37, 7 }
  0x28   :  { %1008 = vmatprep.subr.bf16.mxu0 %v1105_v39 }
  0x29   :  { %v293_v39 = vsub.s32 0, %v292_v38  ;;  %v301_v46 = vsub.s32 2, %v292_v38 }
  0x2a   :  { %171 = vmatmul.mubr.bf16.gmra.mrb[4].mxu0 %v29_v41  ;;  %581 = vmatpush1.bf16.msra.mxu1 %v1101_v56  ;;  %v297_v41 = vsub.s32 1, %v292_v38 }
  0x2b   :  { %180 = vmatprep.mubr.bf16.mxu0 %v1213_v1  ;;  %1009 = vmatpush3.bf16.msra.mxu0 %v1107_v43  ;;  %v1515_v42 = vrot.slane %v289_v40, %v293_v39  ;;  %v1527_v58 = vrot.slane %v289_v40, %v301_v46 }
  0x2c   :  { %1010 = vmatprep.subr.bf16.mxu0 %v1110_v44  ;;  %582 = vmatprep.subr.bf16.mxu1 %v1103_v57  ;;  %v1517_v43 = vrot.slane %v289_v40, %v297_v41 }
  0x2e   :  { %583 = vmatpush1.bf16.msra.mxu1 %v1106_v62 }
  0x2f   :  { %1011 = vmatpush3.bf16.msra.mxu0 %v1112_v50  ;;  %584 = vmatprep.subr.bf16.mxu1 %v1108_v0 }
  0x30   :  { %1012 = vmatprep.subr.bf16.mxu0 %v1115_v52 }
  0x32   :  { %181 = vmatmul.mubr.bf16.gmra.mrb[8].mxu0 %v30_v54 }
  0x33   :  { %190 = vmatprep.mubr.bf16.mxu0 %v1213_v1  ;;  %1013 = vmatpush3.bf16.msra.mxu0 %v1117_v53  ;;  %v1111_v1 = vld [vmem:[%s1810_s2 + $0x108] ss:$12 sps:$4 sm:$0xff]  }
  0x34   :  { %1014 = vmatprep.subr.bf16.mxu0 %v1120_v55  ;;  %585 = vmatpush1.bf16.msra.mxu1 %v1111_v1 }
  0x35   :  { %586 = vmatprep.subr.bf16.mxu1 %v1113_v2 }
  0x37   :  { %1015 = vmatpush3.bf16.msra.mxu0 %v1122_v60 }
  0x38   :  { %1016 = vmatprep.subr.bf16.mxu0 %v1125_v61  ;;  %587 = vmatpush1.bf16.msra.mxu1 %v1116_v3 }
  0x39   :  { %588 = vmatprep.subr.bf16.mxu1 %v1118_v4 }
  0x3a   :  { %191 = vmatmul.mubr.bf16.gmra.mrb[12].mxu0 %v31_v63 }
  0x3b   :  { %1017 = vmatpush3.bf16.msra.mxu0 %v1127_v8 }
  0x3c   :  { %589 = vmatpush1.bf16.msra.mxu1 %v1121_v5  ;;  %1018 = vmatprep.subr.bf16.mxu0 %v1130_v10 }
  0x3d   :  { %590 = vmatprep.subr.bf16.mxu1 %v1123_v6 }
  0x3f   :  { %1019 = vmatpush3.bf16.msra.mxu0 %v1132_v12 }
  0x40   :  { %591 = vmatpush1.bf16.msra.mxu1 %v1126_v7 }
  0x41   :  { %592 = vmatprep.subr.bf16.mxu1 %v1128_v9 }
  0x44   :  { %593 = vmatpush1.bf16.msra.mxu1 %v1131_v11 }
  0xf5   :  { %v162_v13 = vpop.f32.mrb[0].mxu0 }
  0xf6   :  { %201 = vst [vmem:[%s1812_s4] sm:$0xff] %v162_v13  ;;  %v164_v14 = vpop.f32.mrb[1].mxu0 }
  0xf7   :  { %202 = vst [vmem:[%s1812_s4 + $0x8] sm:$0xff] %v164_v14  ;;  %v166_v15 = vpop.f32.mrb[2].mxu0 }
  0xf8   :  { %203 = vst [vmem:[%s1812_s4 + $0x10] sm:$0xff] %v166_v15  ;;  %v217_v16 = vpack.c.bf16 %v166_v15, %v162_v13  ;;  %v168_v17 = vpop.f32.mrb[3].mxu0 }
  0xf9   :  { %204 = vst [vmem:[%s1812_s4 + $0x18] sm:$0xff] %v168_v17  ;;  %v218_v18 = vpack.c.bf16 %v168_v17, %v164_v14 }
  0xfb   :  { %594 = vmatprep.mubr.bf16.mxu1 %v218_v18  ;;  %667 = vmatprep.mubr.bf16.mxu0 %v218_v18 }
  0xfc   :  { %595 = vmatmul.mubr.bf16.vlgmr.msra.gmra.mrb[0].mxu1 %v217_v16  ;;  %668 = vmatmul.mubr.bf16.vlgmr.msra.gmra.mrb[16].mxu0 %v217_v16 }
  0xfd   :  { %v172_v19 = vpop.f32.mrb[4].mxu0 }
  0xfe   :  { %205 = vst [vmem:[%s1812_s4 + $0x20] sm:$0xff] %v172_v19  ;;  %v174_v20 = vpop.f32.mrb[5].mxu0 }
  0xff   :  { %206 = vst [vmem:[%s1812_s4 + $0x28] sm:$0xff] %v174_v20  ;;  %v176_v21 = vpop.f32.mrb[6].mxu0 }
 0x100   :  { %207 = vst [vmem:[%s1812_s4 + $0x30] sm:$0xff] %v176_v21  ;;  %v219_v22 = vpack.c.bf16 %v176_v21, %v172_v19  ;;  %v178_v23 = vpop.f32.mrb[7].mxu0 }
 0x101   :  { %208 = vst [vmem:[%s1812_s4 + $0x38] sm:$0xff] %v178_v23  ;;  %v220_v24 = vpack.c.bf16 %v178_v23, %v174_v20 }
 0x103   :  { %604 = vmatprep.mubr.bf16.mxu1 %v220_v24  ;;  %675 = vmatprep.mubr.bf16.mxu0 %v220_v24 }
 0x104   :  { %605 = vmatmul.mubr.bf16.gmra.mrb[4].mxu1 %v219_v22  ;;  %676 = vmatmul.mubr.bf16.gmra.mrb[20].mxu0 %v219_v22 }
 0x105   :  { %v182_v25 = vpop.f32.mrb[8].mxu0 }
 0x106   :  { %209 = vst [vmem:[%s1812_s4 + $0x40] sm:$0xff] %v182_v25  ;;  %v184_v26 = vpop.f32.mrb[9].mxu0 }
 0x107   :  { %210 = vst [vmem:[%s1812_s4 + $0x48] sm:$0xff] %v184_v26  ;;  %v186_v27 = vpop.f32.mrb[10].mxu0 }
 0x108   :  { %211 = vst [vmem:[%s1812_s4 + $0x50] sm:$0xff] %v186_v27  ;;  %v221_v28 = vpack.c.bf16 %v186_v27, %v182_v25  ;;  %v188_v29 = vpop.f32.mrb[11].mxu0 }
 0x109   :  { %212 = vst [vmem:[%s1812_s4 + $0x58] sm:$0xff] %v188_v29  ;;  %v222_v30 = vpack.c.bf16 %v188_v29, %v184_v26 }
 0x10b   :  { %614 = vmatprep.mubr.bf16.mxu1 %v222_v30  ;;  %683 = vmatprep.mubr.bf16.mxu0 %v222_v30 }
 0x10c   :  { %615 = vmatmul.mubr.bf16.gmra.mrb[8].mxu1 %v221_v28  ;;  %684 = vmatmul.mubr.bf16.gmra.mrb[24].mxu0 %v221_v28 }
 0x10d   :  { %v192_v31 = vpop.f32.mrb[12].mxu0 }
 0x10e   :  { %213 = vst [vmem:[%s1812_s4 + $0x60] sm:$0xff] %v192_v31  ;;  %v194_v32 = vpop.f32.mrb[13].mxu0 }
 0x10f   :  { %214 = vst [vmem:[%s1812_s4 + $0x68] sm:$0xff] %v194_v32  ;;  %v196_v33 = vpop.f32.mrb[14].mxu0 }
 0x110   :  { %215 = vst [vmem:[%s1812_s4 + $0x70] sm:$0xff] %v196_v33  ;;  %v223_v34 = vpack.c.bf16 %v196_v33, %v192_v31  ;;  %v198_v35 = vpop.f32.mrb[15].mxu0 }
 0x111   :  { %216 = vst [vmem:[%s1812_s4 + $0x78] sm:$0xff] %v198_v35  ;;  %v224_v36 = vpack.c.bf16 %v198_v35, %v194_v32 }
 0x113   :  { %624 = vmatprep.mubr.bf16.mxu1 %v224_v36  ;;  %691 = vmatprep.mubr.bf16.mxu0 %v224_v36 }
 0x114   :  { %625 = vmatmul.mubr.bf16.gmra.mrb[12].mxu1 %v223_v34  ;;  %692 = vmatmul.mubr.bf16.gmra.mrb[28].mxu0 %v223_v34 }
 0x1cf   :  { %v596_v44 = vpop.f32.mrb[0].mxu1  ;;  %v1020_v45 = vpop.f32.mrb[16].mxu0 }
 0x1d0   :  { %v1520_v47 = vadd.f32 %v596_v44, %v1515_v42  ;;  %v598_v48 = vpop.f32.mrb[1].mxu1  ;;  %v1021_v49 = vpop.f32.mrb[17].mxu0 }
 0x1d1   :  { %v1523_v50 = vadd.f32 %v598_v48, %v1517_v43  ;;  %v1022_v51 = vadd.f32 %v1021_v49, %v1020_v45  ;;  %v600_v52 = vpop.f32.mrb[2].mxu1  ;;  %v1023_v53 = vpop.f32.mrb[18].mxu0 }
 0x1d2   :  { %v602_v54 = vpop.f32.mrb[3].mxu1  ;;  %v1024_v55 = vpop.f32.mrb[19].mxu0  ;;  %v1533_v60 = vadd.f32 %v600_v52, %v1515_v42 }
 0x1d3   :  { %v1025_v56 = vadd.f32 %v1024_v55, %v1023_v53  ;;  %v700_v57 = vmax.f32 %v1520_v47, %v1523_v50  ;;  %v1536_v61 = vadd.f32 %v602_v54, %v1517_v43  ;;  %v1540_v0 = vadd.f32 %v1022_v51, %v1527_v58 }
 0x1d5   :  { %701 = vmax.xlane.f32.xlu0 %v700_v57  ;;  %v1530_v59 = vadd.f32 %v1025_v56, %v1527_v58  ;;  %v703_v10 = vmax.f32 %v1533_v60, %v1536_v61 }
 0x1d7   :  { %v606_v62 = vpop.f32.mrb[4].mxu1  ;;  %v1026_v63 = vpop.f32.mrb[20].mxu0  ;;  %742 = vmax.xlane.f32.xlu1 %v1530_v59 }
 0x1d8   :  { %v1543_v1 = vadd.f32 %v606_v62, %v1515_v42  ;;  %v608_v2 = vpop.f32.mrb[5].mxu1  ;;  %v1027_v3 = vpop.f32.mrb[21].mxu0 }
 0x1d9   :  { %v1546_v4 = vadd.f32 %v608_v2, %v1517_v43  ;;  %v1028_v5 = vadd.f32 %v1027_v3, %v1026_v63  ;;  %v610_v6 = vpop.f32.mrb[6].mxu1  ;;  %v1029_v7 = vpop.f32.mrb[22].mxu0  ;;  %740 = vmax.xlane.f32.xlu0 %v1540_v0 }
 0x1da   :  { %v612_v8 = vpop.f32.mrb[7].mxu1  ;;  %v1030_v9 = vpop.f32.mrb[23].mxu0  ;;  %v1552_v11 = vadd.f32 %v610_v6, %v1515_v42 }
 0x1db   :  { %v1555_v12 = vadd.f32 %v612_v8, %v1517_v43  ;;  %v1031_v13 = vadd.f32 %v1030_v9, %v1029_v7  ;;  %v706_v14 = vmax.f32 %v1543_v1, %v1546_v4  ;;  %v1562_v18 = vadd.f32 %v1028_v5, %v1527_v58 }
 0x1dd   :  { %707 = vmax.xlane.f32.xlu1 %v706_v14  ;;  %704 = vmax.xlane.f32.xlu0 %v703_v10  ;;  %v709_v17 = vmax.f32 %v1552_v11, %v1555_v12  ;;  %v1572_v28 = vadd.f32 %v1031_v13, %v1527_v58 }
 0x1df   :  { %v616_v15 = vpop.f32.mrb[8].mxu1  ;;  %v1032_v16 = vpop.f32.mrb[24].mxu0 }
 0x1e0   :  { %v1565_v19 = vadd.f32 %v616_v15, %v1515_v42  ;;  %v618_v20 = vpop.f32.mrb[9].mxu1  ;;  %v1033_v21 = vpop.f32.mrb[25].mxu0 }
 0x1e1   :  { %v1568_v22 = vadd.f32 %v618_v20, %v1517_v43  ;;  %v1034_v23 = vadd.f32 %v1033_v21, %v1032_v16  ;;  %v620_v24 = vpop.f32.mrb[10].mxu1  ;;  %v1035_v25 = vpop.f32.mrb[26].mxu0  ;;  %710 = vmax.xlane.f32.xlu1 %v709_v17  ;;  %744 = vmax.xlane.f32.xlu0 %v1562_v18 }
 0x1e2   :  { %v622_v26 = vpop.f32.mrb[11].mxu1  ;;  %v1036_v27 = vpop.f32.mrb[27].mxu0  ;;  %v1575_v29 = vadd.f32 %v620_v24, %v1515_v42 }
 0x1e3   :  { %v1578_v30 = vadd.f32 %v622_v26, %v1517_v43  ;;  %v1037_v31 = vadd.f32 %v1036_v27, %v1035_v25  ;;  %v712_v32 = vmax.f32 %v1565_v19, %v1568_v22  ;;  %v1586_v36 = vadd.f32 %v1034_v23, %v1527_v58 }
 0x1e5   :  { %746 = vmax.xlane.f32.xlu1 %v1572_v28  ;;  %713 = vmax.xlane.f32.xlu0 %v712_v32  ;;  %v715_v35 = vmax.f32 %v1575_v29, %v1578_v30  ;;  %v1596_v49 = vadd.f32 %v1037_v31, %v1527_v58 }
 0x1e7   :  { %v626_v33 = vpop.f32.mrb[12].mxu1  ;;  %v1038_v34 = vpop.f32.mrb[28].mxu0 }
 0x1e8   :  { %v1589_v37 = vadd.f32 %v626_v33, %v1515_v42  ;;  %v628_v38 = vpop.f32.mrb[13].mxu1  ;;  %v1039_v39 = vpop.f32.mrb[29].mxu0 }
 0x1e9   :  { %v1592_v40 = vadd.f32 %v628_v38, %v1517_v43  ;;  %v1040_v41 = vadd.f32 %v1039_v39, %v1038_v34  ;;  %716 = vmax.xlane.f32.xlu1 %v715_v35  ;;  %748 = vmax.xlane.f32.xlu0 %v1586_v36  ;;  %v630_v44 = vpop.f32.mrb[14].mxu1  ;;  %v1041_v45 = vpop.f32.mrb[30].mxu0 }
 0x1ea   :  { %v632_v46 = vpop.f32.mrb[15].mxu1  ;;  %v1042_v48 = vpop.f32.mrb[31].mxu0  ;;  %v1599_v51 = vadd.f32 %v630_v44, %v1515_v42 }
 0x1eb   :  { %v1602_v52 = vadd.f32 %v632_v46, %v1517_v43  ;;  %v1043_v53 = vadd.f32 %v1042_v48, %v1041_v45  ;;  %v718_v54 = vmax.f32 %v1589_v37, %v1592_v40  ;;  %v1610_v56 = vadd.f32 %v1040_v41, %v1527_v58 }
 0x1ed   :  { %750 = vmax.xlane.f32.xlu1 %v1596_v49  ;;  %719 = vmax.xlane.f32.xlu0 %v718_v54  ;;  %v721_v55 = vmax.f32 %v1599_v51, %v1602_v52  ;;  %v1614_v42 = vadd.f32 %v1043_v53, %v1527_v58 }
 0x1f1   :  { %722 = vmax.xlane.f32.xlu1 %v721_v55  ;;  %752 = vmax.xlane.f32.xlu0 %v1610_v56 }
 0x1f5   :  { %754 = vmax.xlane.f32.xlu1 %v1614_v42 }
 0x262   :  { %v702_v43 = vpop.xlane.xlu0 %701 }
 0x263   :  { %v1618_v57 = vsub.f32 %v1520_v47, %v702_v43  ;;  %v1621_v62 = vsub.f32 %v1523_v50, %v702_v43 }
 0x264   :  { %v743_v63 = vpop.xlane.xlu1 %742 }
 0x265   :  { %v764_v2 = vmul.f32 1.442695, %v1618_v57  ;;  %v1625_v3 = vsub.f32 %v1530_v59, %v743_v63  ;;  %v766_v5 = vmul.f32 1.442695, %v1621_v62 }
 0x266   :  { %v741_v6 = vpop.xlane.xlu0 %740 }
 0x267   :  { %v854_v58 = vmul.f32 1.442695, %v1625_v3  ;;  %v1630_v7 = vsub.f32 %v1540_v0, %v741_v6  ;;  %1133 = vpow2.f32 %v764_v2 }
 0x269   :  { %1135 = vpow2.f32 %v854_v58  ;;  %v852_v47 = vmul.f32 1.442695, %v1630_v7 }
 0x26a   :  { %1137 = vpow2.f32 %v766_v5  ;;  %v708_v50 = vpop.xlane.xlu1 %707  ;;  %v705_v8 = vpop.xlane.xlu0 %704 }
 0x26b   :  { %1139 = vpow2.f32 %v852_v47  ;;  %v1634_v9 = vsub.f32 %v1543_v1, %v708_v50  ;;  %v1637_v59 = vsub.f32 %v1533_v60, %v705_v8  ;;  %v1640_v10 = vsub.f32 %v1546_v4, %v708_v50 }
 0x26c   :  { %v1643_v0 = vsub.f32 %v1536_v61, %v705_v8 }
 0x26d   :  { %v768_v13 = vmul.f32 1.442695, %v1637_v59  ;;  %v772_v17 = vmul.f32 1.442695, %v1634_v9  ;;  %v774_v60 = vmul.f32 1.442695, %v1640_v10 }
 0x26e   :  { %v770_v14 = vmul.f32 1.442695, %v1643_v0  ;;  %v711_v15 = vpop.xlane.xlu1 %710  ;;  %v745_v16 = vpop.xlane.xlu0 %744 }
 0x26f   :  { %v1649_v1 = vsub.f32 %v1562_v18, %v745_v16  ;;  %v1653_v20 = vsub.f32 %v1552_v11, %v711_v15  ;;  %1141 = vpow2.f32 %v768_v13  ;;  %v1656_v61 = vsub.f32 %v1555_v12, %v711_v15 }
 0x270   :  { %1143 = vpow2.f32 %v770_v14 }
 0x271   :  { %v856_v4 = vmul.f32 1.442695, %v1649_v1  ;;  %v1134_v21 = vpop.eup %1133  ;;  %1145 = vpow2.f32 %v772_v17  ;;  %v776_v12 = vmul.f32 1.442695, %v1653_v20  ;;  %v778_v32 = vmul.f32 1.442695, %v1656_v61 }
 0x272   :  { %v747_v23 = vpop.xlane.xlu1 %746  ;;  %v714_v24 = vpop.xlane.xlu0 %713  ;;  %1147 = vpow2.f32 %v774_v60 }
 0x273   :  { %v1136_v25 = vpop.eup %1135  ;;  %v1660_v18 = vsub.f32 %v1572_v28, %v747_v23  ;;  %v1663_v26 = vsub.f32 %v1565_v19, %v714_v24  ;;  %v1666_v11 = vsub.f32 %v1568_v22, %v714_v24  ;;  %1149 = vpow2.f32 %v856_v4 }
 0x274   :  { %v1138_v27 = vpop.eup %1137  ;;  %870 = vadd.xlane.f32.xlu1 %v1136_v25 }
 0x275   :  { %v1140_v31 = vpop.eup %1139  ;;  %v858_v33 = vmul.f32 1.442695, %v1660_v18  ;;  %v780_v28 = vmul.f32 1.442695, %v1663_v26  ;;  %v782_v34 = vmul.f32 1.442695, %v1666_v11  ;;  %v796_v41 = vadd.f32 %v1138_v27, %v1134_v21 }
 0x276   :  { %v717_v19 = vpop.xlane.xlu1 %716  ;;  %v749_v35 = vpop.xlane.xlu0 %748  ;;  %868 = vadd.xlane.f32.xlu0 %v1140_v31 }
 0x277   :  { %1151 = vpow2.f32 %v858_v33  ;;  %v1674_v22 = vsub.f32 %v1575_v29, %v717_v19  ;;  %v1677_v38 = vsub.f32 %v1578_v30, %v717_v19  ;;  %v1680_v39 = vsub.f32 %v1586_v36, %v749_v35 }
 0x278   :  { %1153 = vpow2.f32 %v776_v12 }
 0x279   :  { %1155 = vpow2.f32 %v778_v32  ;;  %v784_v44 = vmul.f32 1.442695, %v1674_v22  ;;  %v860_v45 = vmul.f32 1.442695, %v1680_v39  ;;  %v786_v46 = vmul.f32 1.442695, %v1677_v38  ;;  %v1142_v53 = vpop.eup %1141 }
 0x27a   :  { %1157 = vpow2.f32 %v780_v28  ;;  %v751_v48 = vpop.xlane.xlu1 %750  ;;  %797 = vadd.xlane.f32.xlu0 %v796_v41  ;;  %v720_v29 = vpop.xlane.xlu0 %719 }
 0x27b   :  { %1159 = vpow2.f32 %v782_v34  ;;  %v1686_v30 = vsub.f32 %v1596_v49, %v751_v48  ;;  %v1689_v36 = vsub.f32 %v1589_v37, %v720_v29  ;;  %v1692_v54 = vsub.f32 %v1592_v40, %v720_v29  ;;  %v1144_v55 = vpop.eup %1143 }
 0x27c   :  { %1161 = vpow2.f32 %v784_v44  ;;  %v1146_v43 = vpop.eup %1145  ;;  %v799_v49 = vadd.f32 %v1144_v55, %v1142_v53 }
 0x27d   :  { %1163 = vpow2.f32 %v860_v45  ;;  %v862_v63 = vmul.f32 1.442695, %v1686_v30  ;;  %v788_v2 = vmul.f32 1.442695, %v1689_v36  ;;  %v790_v5 = vmul.f32 1.442695, %v1692_v54  ;;  %v1148_v6 = vpop.eup %1147 }
 0x27e   :  { %1165 = vpow2.f32 %v786_v46  ;;  %v723_v58 = vpop.xlane.xlu1 %722  ;;  %v753_v47 = vpop.xlane.xlu0 %752  ;;  %800 = vadd.xlane.f32.xlu1 %v799_v49  ;;  %v802_v60 = vadd.f32 %v1148_v6, %v1146_v43 }
 0x27f   :  { %v1150_v37 = vpop.eup %1149  ;;  %1167 = vpow2.f32 %v862_v63  ;;  %v1698_v40 = vsub.f32 %v1599_v51, %v723_v58  ;;  %v1701_v50 = vsub.f32 %v1602_v52, %v723_v58  ;;  %v1706_v15 = vsub.f32 %v1610_v56, %v753_v47 }
 0x280   :  { %1169 = vpow2.f32 %v788_v2  ;;  %872 = vadd.xlane.f32.xlu0 %v1150_v37 }
 0x281   :  { %v1152_v8 = vpop.eup %1151  ;;  %1171 = vpow2.f32 %v790_v5  ;;  %v792_v13 = vmul.f32 1.442695, %v1698_v40  ;;  %v794_v14 = vmul.f32 1.442695, %v1701_v50  ;;  %v864_v21 = vmul.f32 1.442695, %v1706_v15 }
 0x282   :  { %v1154_v16 = vpop.eup %1153  ;;  %v755_v17 = vpop.xlane.xlu1 %754  ;;  %874 = vadd.xlane.f32.xlu1 %v1152_v8 }
 0x283   :  { %v1156_v51 = vpop.eup %1155  ;;  %1173 = vpow2.f32 %v792_v13  ;;  %v1710_v23 = vsub.f32 %v1614_v42, %v755_v17 }
 0x284   :  { %v1158_v4 = vpop.eup %1157  ;;  %803 = vadd.xlane.f32.xlu0 %v802_v60  ;;  %1175 = vpow2.f32 %v794_v14  ;;  %v805_v25 = vadd.f32 %v1156_v51, %v1154_v16 }
 0x285   :  { %v1160_v52 = vpop.eup %1159  ;;  %1177 = vpow2.f32 %v864_v21  ;;  %v866_v31 = vmul.f32 1.442695, %v1710_v23 }
 0x286   :  { %v1162_v24 = vpop.eup %1161  ;;  %806 = vadd.xlane.f32.xlu1 %v805_v25  ;;  %v808_v33 = vadd.f32 %v1160_v52, %v1158_v4 }
 0x287   :  { %v1164_v27 = vpop.eup %1163  ;;  %1179 = vpow2.f32 %v866_v31 }
 0x288   :  { %v1166_v56 = vpop.eup %1165  ;;  %876 = vadd.xlane.f32.xlu0 %v1164_v27 }
 0x289   :  { %v1168_v12 = vpop.eup %1167  ;;  %v811_v19 = vadd.f32 %v1166_v56, %v1162_v24 }
 0x28a   :  { %v1170_v32 = vpop.eup %1169  ;;  %878 = vadd.xlane.f32.xlu1 %v1168_v12 }
 0x28b   :  { %v1172_v28 = vpop.eup %1171 }
 0x28c   :  { %809 = vadd.xlane.f32.xlu0 %v808_v33  ;;  %v814_v42 = vadd.f32 %v1172_v28, %v1170_v32 }
 0x28d   :  { %v1174_v34 = vpop.eup %1173 }
 0x28e   :  { %v1176_v35 = vpop.eup %1175  ;;  %812 = vadd.xlane.f32.xlu1 %v811_v19 }
 0x28f   :  { %v817_v41 = vadd.f32 %v1176_v35, %v1174_v34  ;;  %v1178_v44 = vpop.eup %1177 }
 0x290   :  { %815 = vadd.xlane.f32.xlu0 %v814_v42 }
 0x291   :  { %v1180_v45 = vpop.eup %1179 }
 0x292   :  { %818 = vadd.xlane.f32.xlu1 %v817_v41 }
 0x294   :  { %880 = vadd.xlane.f32.xlu0 %v1178_v44 }
 0x296   :  { %882 = vadd.xlane.f32.xlu1 %v1180_v45 }
 0x301   :  { %v871_v46 = vpop.xlane.xlu1 %870 }
 0x302   :  { %1181 = vlog2.f32 %v871_v46 }
 0x303   :  { %v869_v48 = vpop.xlane.xlu0 %868 }
 0x304   :  { %1183 = vlog2.f32 %v869_v48 }
 0x307   :  { %v798_v29 = vpop.xlane.xlu0 %797 }
 0x308   :  { %1185 = vlog2.f32 %v798_v29 }
 0x30b   :  { %v801_v43 = vpop.xlane.xlu1 %800 }
 0x30c   :  { %v1182_v53 = vpop.eup %1181  ;;  %1187 = vlog2.f32 %v801_v43 }
 0x30d   :  { %v887_v55 = vmul.f32 0.6931472, %v1182_v53  ;;  %v873_v63 = vpop.xlane.xlu0 %872 }
 0x30e   :  { %v1184_v2 = vpop.eup %1183  ;;  %1189 = vlog2.f32 %v873_v63 }
 0x30f   :  { %v901_v5 = vsub.f32 %v1625_v3, %v887_v55  ;;  %v885_v6 = vmul.f32 0.6931472, %v1184_v2  ;;  %v875_v58 = vpop.xlane.xlu1 %874 }
 0x310   :  { %1191 = vlog2.f32 %v875_v58 }
 0x311   :  { %913 = vst [vmem:[%s1814_s5 + $0x28] sm:$0xff] %v901_v5  ;;  %v900_v49 = vsub.f32 %v1630_v7, %v885_v6  ;;  %v804_v47 = vpop.xlane.xlu0 %803 }
 0x312   :  { %v1186_v37 = vpop.eup %1185  ;;  %1193 = vlog2.f32 %v804_v47 }
 0x313   :  { %910 = vst [vmem:[%s1814_s5 + $0x10] sm:$0xff] %v900_v49  ;;  %v821_v8 = vmul.f32 0.6931472, %v1186_v37  ;;  %v807_v14 = vpop.xlane.xlu1 %806 }
 0x314   :  { %1195 = vlog2.f32 %v807_v14 }
 0x315   :  { %v836_v3 = vsub.f32 %v1618_v57, %v821_v8  ;;  %v837_v13 = vsub.f32 %v1621_v62, %v821_v8  ;;  %v877_v16 = vpop.xlane.xlu0 %876 }
 0x316   :  { %1197 = vlog2.f32 %v877_v16  ;;  %v1188_v7 = vpop.eup %1187 }
 0x317   :  { %908 = vst [vmem:[%s1814_s5] sm:$0xff] %v836_v3  ;;  %909 = vst [vmem:[%s1814_s5 + $0x8] sm:$0xff] %v837_v13  ;;  %v823_v60 = vmul.f32 0.6931472, %v1188_v7  ;;  %v879_v51 = vpop.xlane.xlu1 %878 }
 0x318   :  { %v1190_v17 = vpop.eup %1189  ;;  %1199 = vlog2.f32 %v879_v51 }
 0x319   :  { %v810_v4 = vpop.xlane.xlu0 %809  ;;  %v889_v57 = vmul.f32 0.6931472, %v1190_v17  ;;  %v838_v62 = vsub.f32 %v1637_v59, %v823_v60  ;;  %v839_v52 = vsub.f32 %v1643_v0, %v823_v60 }
 0x31a   :  { %1201 = vlog2.f32 %v810_v4  ;;  %v1192_v21 = vpop.eup %1191 }
 0x31b   :  { %v902_v24 = vsub.f32 %v1649_v1, %v889_v57  ;;  %911 = vst [vmem:[%s1814_s5 + $0x18] sm:$0xff] %v838_v62  ;;  %912 = vst [vmem:[%s1814_s5 + $0x20] sm:$0xff] %v839_v52  ;;  %v891_v27 = vmul.f32 0.6931472, %v1192_v21  ;;  %v813_v56 = vpop.xlane.xlu1 %812 }
 0x31c   :  { %v1194_v25 = vpop.eup %1193  ;;  %1203 = vlog2.f32 %v813_v56 }
 0x31d   :  { %v816_v12 = vpop.xlane.xlu0 %815  ;;  %916 = vst [vmem:[%s1814_s5 + $0x40] sm:$0xff] %v902_v24  ;;  %v825_v59 = vmul.f32 0.6931472, %v1194_v25  ;;  %v903_v0 = vsub.f32 %v1660_v18, %v891_v27 }
 0x31e   :  { %1205 = vlog2.f32 %v816_v12  ;;  %v1196_v1 = vpop.eup %1195 }
 0x31f   :  { %v840_v31 = vsub.f32 %v1634_v9, %v825_v59  ;;  %v841_v32 = vsub.f32 %v1640_v10, %v825_v59  ;;  %919 = vst [vmem:[%s1814_s5 + $0x58] sm:$0xff] %v903_v0  ;;  %v827_v28 = vmul.f32 0.6931472, %v1196_v1  ;;  %v819_v34 = vpop.xlane.xlu1 %818 }
 0x320   :  { %v1198_v33 = vpop.eup %1197  ;;  %1207 = vlog2.f32 %v819_v34 }
 0x321   :  { %v881_v19 = vpop.xlane.xlu0 %880  ;;  %914 = vst [vmem:[%s1814_s5 + $0x30] sm:$0xff] %v840_v31  ;;  %915 = vst [vmem:[%s1814_s5 + $0x38] sm:$0xff] %v841_v32  ;;  %v893_v18 = vmul.f32 0.6931472, %v1198_v33  ;;  %v842_v9 = vsub.f32 %v1653_v20, %v827_v28  ;;  %v843_v10 = vsub.f32 %v1656_v61, %v827_v28 }
 0x322   :  { %1209 = vlog2.f32 %v881_v19  ;;  %v1200_v42 = vpop.eup %1199 }
 0x323   :  { %v904_v35 = vsub.f32 %v1680_v39, %v893_v18  ;;  %917 = vst [vmem:[%s1814_s5 + $0x48] sm:$0xff] %v842_v9  ;;  %918 = vst [vmem:[%s1814_s5 + $0x50] sm:$0xff] %v843_v10  ;;  %v895_v44 = vmul.f32 0.6931472, %v1200_v42  ;;  %v883_v45 = vpop.xlane.xlu1 %882 }
 0x324   :  { %v1202_v41 = vpop.eup %1201  ;;  %1211 = vlog2.f32 %v883_v45 }
 0x325   :  { %922 = vst [vmem:[%s1814_s5 + $0x70] sm:$0xff] %v904_v35  ;;  %v829_v20 = vmul.f32 0.6931472, %v1202_v41  ;;  %v905_v61 = vsub.f32 %v1686_v30, %v895_v44 }
 0x326   :  { %v1204_v39 = vpop.eup %1203 }
 0x327   :  { %v844_v46 = vsub.f32 %v1663_v26, %v829_v20  ;;  %v845_v48 = vsub.f32 %v1666_v11, %v829_v20  ;;  %925 = vst [vmem:[%s1814_s5 + $0x88] sm:$0xff] %v905_v61  ;;  %v831_v53 = vmul.f32 0.6931472, %v1204_v39 }
 0x328   :  { %v1206_v29 = vpop.eup %1205 }
 0x329   :  { %920 = vst [vmem:[%s1814_s5 + $0x60] sm:$0xff] %v844_v46  ;;  %921 = vst [vmem:[%s1814_s5 + $0x68] sm:$0xff] %v845_v48  ;;  %v833_v30 = vmul.f32 0.6931472, %v1206_v29  ;;  %v846_v55 = vsub.f32 %v1674_v22, %v831_v53  ;;  %v847_v26 = vsub.f32 %v1677_v38, %v831_v53 }
 0x32a   :  { %v1208_v11 = vpop.eup %1207 }
 0x32b   :  { %v848_v43 = vsub.f32 %v1689_v36, %v833_v30  ;;  %v849_v63 = vsub.f32 %v1692_v54, %v833_v30  ;;  %923 = vst [vmem:[%s1814_s5 + $0x78] sm:$0xff] %v846_v55  ;;  %924 = vst [vmem:[%s1814_s5 + $0x80] sm:$0xff] %v847_v26  ;;  %v835_v5 = vmul.f32 0.6931472, %v1208_v11 }
 0x32c   :  { %v1210_v2 = vpop.eup %1209 }
 0x32d   :  { %926 = vst [vmem:[%s1814_s5 + $0x90] sm:$0xff] %v848_v43  ;;  %927 = vst [vmem:[%s1814_s5 + $0x98] sm:$0xff] %v849_v63  ;;  %v897_v22 = vmul.f32 0.6931472, %v1210_v2  ;;  %v850_v38 = vsub.f32 %v1698_v40, %v835_v5  ;;  %v851_v36 = vsub.f32 %v1701_v50, %v835_v5 }
 0x32e   :  { %v1212_v54 = vpop.eup %1211 }
 0x32f   :  { %v906_v6 = vsub.f32 %v1706_v15, %v897_v22  ;;  %929 = vst [vmem:[%s1814_s5 + $0xa8] sm:$0xff] %v850_v38  ;;  %930 = vst [vmem:[%s1814_s5 + $0xb0] sm:$0xff] %v851_v36  ;;  %v899_v49 = vmul.f32 0.6931472, %v1212_v54 }
 0x331   :  { %928 = vst [vmem:[%s1814_s5 + $0xa0] sm:$0xff] %v906_v6  ;;  %v907_v40 = vsub.f32 %v1710_v23, %v899_v49 }
 0x333   :  { %931 = vst [vmem:[%s1814_s5 + $0xb8] sm:$0xff] %v907_v40 }

// kernel: path_integration_sequence.2
= control target key start
LH: loop header
LB: loop body
LE: loop exit
PB: predicated region body
PF: predicated region fallthrough
CT: control target
= control target key end

     0   :  { %v3068_v1 = vmov 0   ;;  %s3852_s3 = inlined_call_operand.vmem [shape: bf16[128,512], index: 3, kind: input, shape index: {}]   ;;  %s3853_s1 = inlined_call_operand.vmem [shape: f32[8,128], index: 1, kind: input, shape index: {}]   ;;  %s3854_s0 = inlined_call_operand.vmem [shape: f32[8,8,512], index: 0, kind: input, shape index: {}]   ;;  %s3855_s2 = inlined_call_operand.vmem [shape: f32[8,128], index: 2, kind: input, shape index: {}]   ;;  %s3856_s4 = inlined_call_operand.vmem [shape: f32[8,8,128], index: 4, kind: output, shape index: {0}]   ;;  %s3857_s6 = inlined_call_operand.vmem [shape: f32[8,128], index: 6, kind: output, shape index: {2}]   ;;  %s3858_s5 = inlined_call_operand.vmem [shape: f32[8,128], index: 5, kind: output, shape index: {1}]  }
   0x1   :  { %v3107_v0 = vld [vmem:[%s3852_s3 + $0x4] ss:$16 sps:$4 sm:$0xff]   ;;  %260 = vmatprep.mubr.bf16.mxu0 %v3068_v1  ;;  %301 = vmatprep.mubr.bf16.mxu1 %v3068_v1  ;;  %v3114_v2 = vld [vmem:[%s3852_s3] ss:$16 sps:$4 sm:$0xff]   ;;  %v3137_v6 = vld [vmem:[%s3852_s3 + $0xc] ss:$16 sps:$4 sm:$0xff]  }
   0x2   :  { %228 = vmatprep.subr.bf16.mxu0 %v3107_v0  ;;  %v3120_v3 = vld [vmem:[%s3852_s3 + $0x24] ss:$16 sps:$4 sm:$0xff]   ;;  %v3126_v4 = vld [vmem:[%s3852_s3 + $0x20] ss:$16 sps:$4 sm:$0xff]   ;;  %v3142_v7 = vld [vmem:[%s3852_s3 + $0x8] ss:$16 sps:$4 sm:$0xff]   ;;  %269 = vmatprep.subr.bf16.mxu1 %v3137_v6 }
   0x3   :  { %229 = vmatpush1.bf16.msra.mxu0 %v3114_v2  ;;  %v3132_v5 = vld [vmem:[%s3852_s3 + $0x44] ss:$16 sps:$4 sm:$0xff]   ;;  %v3148_v8 = vld [vmem:[%s3852_s3 + $0x40] ss:$16 sps:$4 sm:$0xff]   ;;  %270 = vmatpush1.bf16.msra.mxu1 %v3142_v7  ;;  %v3161_v10 = vld [vmem:[%s3852_s3 + $0x2c] ss:$16 sps:$4 sm:$0xff]  }
   0x4   :  { %230 = vmatprep.subr.bf16.mxu0 %v3120_v3  ;;  %v3155_v9 = vld [vmem:[%s3852_s3 + $0x64] ss:$16 sps:$4 sm:$0xff]   ;;  %v3166_v11 = vld [vmem:[%s3852_s3 + $0x28] ss:$16 sps:$4 sm:$0xff]   ;;  %271 = vmatprep.subr.bf16.mxu1 %v3161_v10  ;;  %v3173_v12 = vld [vmem:[%s3852_s3 + $0x60] ss:$16 sps:$4 sm:$0xff]  }
   0x5   :  { %v3178_v13 = vld [vmem:[%s3852_s3 + $0x84] ss:$16 sps:$4 sm:$0xff]   ;;  %v3183_v14 = vld [vmem:[%s3852_s3 + $0x4c] ss:$16 sps:$4 sm:$0xff]   ;;  %v3190_v15 = vld [vmem:[%s3852_s3 + $0x48] ss:$16 sps:$4 sm:$0xff]  }
   0x6   :  { %v3196_v16 = vld [vmem:[%s3852_s3 + $0x6c] ss:$16 sps:$4 sm:$0xff]   ;;  %v3202_v17 = vld [vmem:[%s3852_s3 + $0x80] ss:$16 sps:$4 sm:$0xff]   ;;  %v3208_v18 = vld [vmem:[%s3852_s3 + $0xa4] ss:$16 sps:$4 sm:$0xff]  }
   0x7   :  { %231 = vmatpush1.bf16.msra.mxu0 %v3126_v4  ;;  %272 = vmatpush1.bf16.msra.mxu1 %v3166_v11  ;;  %v3214_v19 = vld [vmem:[%s3852_s3 + $0x68] ss:$16 sps:$4 sm:$0xff]   ;;  %v3220_v20 = vld [vmem:[%s3852_s3 + $0x8c] ss:$16 sps:$4 sm:$0xff]   ;;  %v3225_v21 = vld [vmem:[%s3852_s3 + $0xa0] ss:$16 sps:$4 sm:$0xff]  }
   0x8   :  { %232 = vmatprep.subr.bf16.mxu0 %v3132_v5  ;;  %273 = vmatprep.subr.bf16.mxu1 %v3183_v14  ;;  %v3231_v22 = vld [vmem:[%s3852_s3 + $0xc4] ss:$16 sps:$4 sm:$0xff]   ;;  %v3238_v23 = vld [vmem:[%s3852_s3 + $0x88] ss:$16 sps:$4 sm:$0xff]   ;;  %v3243_v24 = vld [vmem:[%s3852_s3 + $0xc0] ss:$16 sps:$4 sm:$0xff]  }
   0x9   :  { %v3249_v25 = vld [vmem:[%s3852_s3 + $0xac] ss:$16 sps:$4 sm:$0xff]   ;;  %v3254_v26 = vld [vmem:[%s3852_s3 + $0xe4] ss:$16 sps:$4 sm:$0xff]   ;;  %v3259_v27 = vld [vmem:[%s3852_s3 + $0xa8] ss:$16 sps:$4 sm:$0xff]  }
   0xa   :  { %v3265_v28 = vld [vmem:[%s3852_s3 + $0xcc] ss:$16 sps:$4 sm:$0xff]   ;;  %v3272_v29 = vld [vmem:[%s3852_s3 + $0xe0] ss:$16 sps:$4 sm:$0xff]   ;;  %v3281_v31 = vld [vmem:[%s3852_s3 + $0xc8] ss:$16 sps:$4 sm:$0xff]  }
   0xb   :  { %233 = vmatpush1.bf16.msra.mxu0 %v3148_v8  ;;  %274 = vmatpush1.bf16.msra.mxu1 %v3190_v15  ;;  %v25_v30 = vld [vmem:[%s3853_s1] sm:$0xff]  ;;  %v3287_v32 = vld [vmem:[%s3852_s3 + $0xec] ss:$16 sps:$4 sm:$0xff]   ;;  %v3297_v34 = vld [vmem:[%s3852_s3 + $0xe8] ss:$16 sps:$4 sm:$0xff]  }
   0xc   :  { %234 = vmatprep.subr.bf16.mxu0 %v3155_v9  ;;  %275 = vmatprep.subr.bf16.mxu1 %v3196_v16  ;;  %v35_v33 = vpack.c.bf16 %v25_v30, %v25_v30  ;;  %v31_v35 = vld [vmem:[%s3854_s0] sm:$0xff]  ;;  %v32_v36 = vld [vmem:[%s3854_s0 + $0x8] sm:$0xff]  ;;  %v34_v45 = vld [vmem:[%s3854_s0 + $0x18] sm:$0xff] }
   0xd   :  { %v33_v51 = vld [vmem:[%s3854_s0 + $0x10] sm:$0xff]  ;;  %v27_v60 = vld [vmem:[%s3855_s2] sm:$0xff] }
   0xf   :  { %235 = vmatpush1.bf16.msra.mxu0 %v3173_v12  ;;  %276 = vmatpush1.bf16.msra.mxu1 %v3214_v19 }
  0x10   :  { %236 = vmatprep.subr.bf16.mxu0 %v3178_v13  ;;  %277 = vmatprep.subr.bf16.mxu1 %v3220_v20 }
  0x13   :  { %237 = vmatpush1.bf16.msra.mxu0 %v3202_v17  ;;  %278 = vmatpush1.bf16.msra.mxu1 %v3238_v23 }
  0x14   :  { %238 = vmatprep.subr.bf16.mxu0 %v3208_v18  ;;  %279 = vmatprep.subr.bf16.mxu1 %v3249_v25 }
  0x17   :  { %239 = vmatpush1.bf16.msra.mxu0 %v3225_v21  ;;  %280 = vmatpush1.bf16.msra.mxu1 %v3259_v27 }
  0x18   :  { %240 = vmatprep.subr.bf16.mxu0 %v3231_v22  ;;  %281 = vmatprep.subr.bf16.mxu1 %v3265_v28 }
  0x1b   :  { %241 = vmatpush1.bf16.msra.mxu0 %v3243_v24  ;;  %282 = vmatpush1.bf16.msra.mxu1 %v3281_v31 }
  0x1c   :  { %242 = vmatprep.subr.bf16.mxu0 %v3254_v26  ;;  %283 = vmatprep.subr.bf16.mxu1 %v3287_v32 }
  0x1f   :  { %243 = vmatpush1.bf16.msra.mxu0 %v3272_v29  ;;  %284 = vmatpush1.bf16.msra.mxu1 %v3297_v34 }
  0x20   :  { %537 = vmatprep.subr.bf16.mxu0 %v3107_v0  ;;  %578 = vmatprep.subr.bf16.mxu1 %v3137_v6 }
  0x22   :  { %261 = vmatmul.mubr.bf16.vlgmr.msra.gmra.mrb[0].mxu0 %v35_v33  ;;  %302 = vmatmul.mubr.bf16.vlgmr.msra.gmra.mrb[0].mxu1 %v35_v33 }
  0x23   :  { %538 = vmatpush1.bf16.msra.mxu0 %v3114_v2  ;;  %569 = vmatprep.mubr.bf16.mxu0 %v3068_v1 }
  0x24   :  { %539 = vmatprep.subr.bf16.mxu0 %v3120_v3  ;;  %579 = vmatpush1.bf16.msra.mxu1 %v3142_v7 }
  0x25   :  { %580 = vmatprep.subr.bf16.mxu1 %v3161_v10  ;;  %610 = vmatprep.mubr.bf16.mxu1 %v3068_v1 }
  0x27   :  { %540 = vmatpush1.bf16.msra.mxu0 %v3126_v4 }
  0x28   :  { %541 = vmatprep.subr.bf16.mxu0 %v3132_v5  ;;  %581 = vmatpush1.bf16.msra.mxu1 %v3166_v11 }
  0x29   :  { %582 = vmatprep.subr.bf16.mxu1 %v3183_v14 }
  0x2b   :  { %542 = vmatpush1.bf16.msra.mxu0 %v3148_v8 }
  0x2c   :  { %543 = vmatprep.subr.bf16.mxu0 %v3155_v9  ;;  %583 = vmatpush1.bf16.msra.mxu1 %v3190_v15 }
  0x2d   :  { %584 = vmatprep.subr.bf16.mxu1 %v3196_v16 }
  0x2f   :  { %544 = vmatpush1.bf16.msra.mxu0 %v3173_v12 }
  0x30   :  { %545 = vmatprep.subr.bf16.mxu0 %v3178_v13  ;;  %585 = vmatpush1.bf16.msra.mxu1 %v3214_v19 }
  0x31   :  { %586 = vmatprep.subr.bf16.mxu1 %v3220_v20 }
  0x33   :  { %546 = vmatpush1.bf16.msra.mxu0 %v3202_v17 }
  0x34   :  { %547 = vmatprep.subr.bf16.mxu0 %v3208_v18  ;;  %587 = vmatpush1.bf16.msra.mxu1 %v3238_v23 }
  0x35   :  { %588 = vmatprep.subr.bf16.mxu1 %v3249_v25 }
  0x37   :  { %548 = vmatpush1.bf16.msra.mxu0 %v3225_v21 }
  0x38   :  { %549 = vmatprep.subr.bf16.mxu0 %v3231_v22  ;;  %589 = vmatpush1.bf16.msra.mxu1 %v3259_v27 }
  0x39   :  { %590 = vmatprep.subr.bf16.mxu1 %v3265_v28 }
  0x3b   :  { %550 = vmatpush1.bf16.msra.mxu0 %v3243_v24 }
  0x3c   :  { %551 = vmatprep.subr.bf16.mxu0 %v3254_v26  ;;  %591 = vmatpush1.bf16.msra.mxu1 %v3281_v31 }
  0x3d   :  { %592 = vmatprep.subr.bf16.mxu1 %v3287_v32 }
  0x3f   :  { %552 = vmatpush1.bf16.msra.mxu0 %v3272_v29 }
  0x40   :  { %847 = vmatprep.subr.bf16.mxu0 %v3107_v0  ;;  %593 = vmatpush1.bf16.msra.mxu1 %v3297_v34 }
  0x41   :  { %888 = vmatprep.subr.bf16.mxu1 %v3137_v6 }
  0xf5   :  { %v262_v37 = vpop.f32.mrb[0].mxu0  ;;  %v303_v46 = vpop.f32.mrb[0].mxu1 }
  0xf6   :  { %v310_v38 = vadd.f32 %v262_v37, %v31_v35  ;;  %v264_v39 = vpop.f32.mrb[1].mxu0  ;;  %v305_v47 = vpop.f32.mrb[1].mxu1  ;;  %v312_v53 = vadd.f32 %v303_v46, %v33_v51 }
  0xf7   :  { %v311_v40 = vadd.f32 %v264_v39, %v32_v36  ;;  %v266_v41 = vpop.f32.mrb[2].mxu0  ;;  %v313_v48 = vadd.f32 %v305_v47, %v34_v45  ;;  %v307_v49 = vpop.f32.mrb[2].mxu1 }
  0xf8   :  { %v2560_v42 = vmul.f32 -1.442695, %v310_v38  ;;  %v267_v43 = vpop.f32.mrb[3].mxu0  ;;  %v308_v50 = vpop.f32.mrb[3].mxu1  ;;  %v2564_v41 = vld [vmem:[%s3854_s0 + $0x28] sm:$0xff] }
  0xf9   :  { %v2561_v44 = vmul.f32 -1.442695, %v311_v40  ;;  %v2562_v52 = vmul.f32 -1.442695, %v313_v48  ;;  %v2563_v40 = vld [vmem:[%s3854_s0 + $0x20] sm:$0xff] }
  0xfa   :  { %2940 = vpow2.f32 %v2560_v42 }
  0xfb   :  { %2942 = vpow2.f32 %v2561_v44 }
  0xfc   :  { %2944 = vpow2.f32 %v2562_v52  ;;  %v2566_v52 = vld [vmem:[%s3854_s0 + $0x38] sm:$0xff] }
  0xfd   :  { %2946 = vtanh.f32 %v312_v53 }
 0x104   :  { %v2941_v54 = vpop.eup %2940 }
 0x105   :  { %v2943_v55 = vpop.eup %2942  ;;  %v317_v56 = vadd.f32 1.0, %v2941_v54  ;;  %v2565_v54 = vld [vmem:[%s3854_s0 + $0x30] sm:$0xff] }
 0x106   :  { %v323_v57 = vadd.f32 1.0, %v2943_v55  ;;  %v2945_v58 = vpop.eup %2944 }
 0x107   :  { %2948 = vrcp.f32 %v317_v56  ;;  %v2947_v59 = vpop.eup %2946  ;;  %v330_v62 = vadd.f32 1.0, %v2945_v58 }
 0x108   :  { %2950 = vrcp.f32 %v323_v57 }
 0x109   :  { %2952 = vrcp.f32 %v330_v62 }
 0x111   :  { %v2949_v61 = vpop.eup %2948 }
 0x112   :  { %v2951_v63 = vpop.eup %2950  ;;  %v334_v30 = vmul.f32 %v2949_v61, %v2947_v59 }
 0x113   :  { %v333_v33 = vmul.f32 %v2951_v63, %v27_v60  ;;  %v2953_v36 = vpop.eup %2952 }
 0x115   :  { %v3352_v35 = vadd.f32 %v334_v30, %v333_v33 }
 0x117   :  { %2954 = vtanh.f32 %v3352_v35 }
 0x121   :  { %v2955_v37 = vpop.eup %2954 }
 0x122   :  { %v337_v38 = vmul.f32 %v2955_v37, %v2953_v36 }
 0x124   :  { %338 = vst [vmem:[%s3856_s4] sm:$0xff] %v337_v38  ;;  %v344_v39 = vpack.c.bf16 %v337_v38, %v337_v38 }
 0x126   :  { %570 = vmatmul.mubr.bf16.vlgmr.msra.gmra.mrb[4].mxu0 %v344_v39  ;;  %611 = vmatmul.mubr.bf16.vlgmr.msra.gmra.mrb[4].mxu1 %v344_v39 }
 0x127   :  { %848 = vmatpush1.bf16.msra.mxu0 %v3114_v2  ;;  %889 = vmatpush1.bf16.msra.mxu1 %v3142_v7 }
 0x128   :  { %849 = vmatprep.subr.bf16.mxu0 %v3120_v3  ;;  %890 = vmatprep.subr.bf16.mxu1 %v3161_v10 }
 0x129   :  { %879 = vmatprep.mubr.bf16.mxu0 %v3068_v1  ;;  %920 = vmatprep.mubr.bf16.mxu1 %v3068_v1 }
 0x12b   :  { %850 = vmatpush1.bf16.msra.mxu0 %v3126_v4  ;;  %891 = vmatpush1.bf16.msra.mxu1 %v3166_v11 }
 0x12c   :  { %851 = vmatprep.subr.bf16.mxu0 %v3132_v5  ;;  %892 = vmatprep.subr.bf16.mxu1 %v3183_v14 }
 0x12f   :  { %852 = vmatpush1.bf16.msra.mxu0 %v3148_v8  ;;  %893 = vmatpush1.bf16.msra.mxu1 %v3190_v15 }
 0x130   :  { %853 = vmatprep.subr.bf16.mxu0 %v3155_v9  ;;  %894 = vmatprep.subr.bf16.mxu1 %v3196_v16 }
 0x133   :  { %854 = vmatpush1.bf16.msra.mxu0 %v3173_v12  ;;  %895 = vmatpush1.bf16.msra.mxu1 %v3214_v19 }
 0x134   :  { %855 = vmatprep.subr.bf16.mxu0 %v3178_v13  ;;  %896 = vmatprep.subr.bf16.mxu1 %v3220_v20 }
 0x137   :  { %856 = vmatpush1.bf16.msra.mxu0 %v3202_v17  ;;  %897 = vmatpush1.bf16.msra.mxu1 %v3238_v23 }
 0x138   :  { %857 = vmatprep.subr.bf16.mxu0 %v3208_v18  ;;  %898 = vmatprep.subr.bf16.mxu1 %v3249_v25 }
 0x13b   :  { %858 = vmatpush1.bf16.msra.mxu0 %v3225_v21  ;;  %899 = vmatpush1.bf16.msra.mxu1 %v3259_v27 }
 0x13c   :  { %859 = vmatprep.subr.bf16.mxu0 %v3231_v22  ;;  %900 = vmatprep.subr.bf16.mxu1 %v3265_v28 }
 0x13f   :  { %860 = vmatpush1.bf16.msra.mxu0 %v3243_v24  ;;  %901 = vmatpush1.bf16.msra.mxu1 %v3281_v31 }
 0x140   :  { %861 = vmatprep.subr.bf16.mxu0 %v3254_v26  ;;  %902 = vmatprep.subr.bf16.mxu1 %v3287_v32 }
 0x143   :  { %862 = vmatpush1.bf16.msra.mxu0 %v3272_v29  ;;  %903 = vmatpush1.bf16.msra.mxu1 %v3297_v34 }
 0x144   :  { %1157 = vmatprep.subr.bf16.mxu0 %v3107_v0  ;;  %1198 = vmatprep.subr.bf16.mxu1 %v3137_v6 }
 0x1f9   :  { %v571_v42 = vpop.f32.mrb[4].mxu0  ;;  %v612_v43 = vpop.f32.mrb[4].mxu1 }
 0x1fa   :  { %v619_v44 = vadd.f32 %v2563_v40, %v571_v42  ;;  %v573_v45 = vpop.f32.mrb[5].mxu0  ;;  %v614_v46 = vpop.f32.mrb[5].mxu1  ;;  %v621_v56 = vadd.f32 %v2565_v54, %v612_v43  ;;  %v3520_v54 = vld [vmem:[%s3852_s3 + $0x4c] ss:$16 sps:$4 sm:$0xff]  }
 0x1fb   :  { %v620_v47 = vadd.f32 %v2564_v41, %v573_v45  ;;  %v575_v48 = vpop.f32.mrb[6].mxu0  ;;  %v616_v49 = vpop.f32.mrb[6].mxu1  ;;  %v622_v53 = vadd.f32 %v2566_v52, %v614_v46  ;;  %v3506_v52 = vld [vmem:[%s3852_s3 + $0x28] ss:$16 sps:$4 sm:$0xff]  }
 0x1fc   :  { %v2599_v50 = vmul.f32 -1.442695, %v619_v44  ;;  %v576_v0 = vpop.f32.mrb[7].mxu0  ;;  %v617_v51 = vpop.f32.mrb[7].mxu1  ;;  %v3472_v48 = vld [vmem:[%s3852_s3 + $0xc] ss:$16 sps:$4 sm:$0xff]  }
 0x1fd   :  { %v2600_v6 = vmul.f32 -1.442695, %v620_v47  ;;  %v2601_v55 = vmul.f32 -1.442695, %v622_v53  ;;  %v3467_v47 = vld [vmem:[%s3852_s3 + $0x4] ss:$16 sps:$4 sm:$0xff]  }
 0x1fe   :  { %2956 = vpow2.f32 %v2599_v50  ;;  %v3477_v49 = vld [vmem:[%s3852_s3] ss:$16 sps:$4 sm:$0xff]   ;;  %v3482_v50 = vld [vmem:[%s3852_s3 + $0x8] ss:$16 sps:$4 sm:$0xff]   ;;  %v3491_v0 = vld [vmem:[%s3852_s3 + $0x24] ss:$16 sps:$4 sm:$0xff]  }
 0x1ff   :  { %2958 = vpow2.f32 %v2600_v6  ;;  %v3496_v51 = vld [vmem:[%s3852_s3 + $0x2c] ss:$16 sps:$4 sm:$0xff]   ;;  %v3501_v6 = vld [vmem:[%s3852_s3 + $0x20] ss:$16 sps:$4 sm:$0xff]   ;;  %v3515_v53 = vld [vmem:[%s3852_s3 + $0x44] ss:$16 sps:$4 sm:$0xff]  }
 0x200   :  { %2960 = vpow2.f32 %v2601_v55  ;;  %v3525_v55 = vld [vmem:[%s3852_s3 + $0x40] ss:$16 sps:$4 sm:$0xff]  }
 0x201   :  { %2962 = vtanh.f32 %v621_v56  ;;  %v3530_v56 = vld [vmem:[%s3852_s3 + $0x48] ss:$16 sps:$4 sm:$0xff]  }
 0x208   :  { %v2957_v57 = vpop.eup %2956 }
 0x209   :  { %v2959_v58 = vpop.eup %2958  ;;  %v626_v59 = vadd.f32 1.0, %v2957_v57  ;;  %v3539_v57 = vld [vmem:[%s3852_s3 + $0x64] ss:$16 sps:$4 sm:$0xff]  }
 0x20a   :  { %v632_v60 = vadd.f32 1.0, %v2959_v58  ;;  %v2961_v61 = vpop.eup %2960  ;;  %v3544_v58 = vld [vmem:[%s3852_s3 + $0x6c] ss:$16 sps:$4 sm:$0xff]  }
 0x20b   :  { %2964 = vrcp.f32 %v626_v59  ;;  %v2963_v62 = vpop.eup %2962  ;;  %v639_v36 = vadd.f32 1.0, %v2961_v61  ;;  %v3549_v59 = vld [vmem:[%s3852_s3 + $0x60] ss:$16 sps:$4 sm:$0xff]   ;;  %v3563_v61 = vld [vmem:[%s3852_s3 + $0x84] ss:$16 sps:$4 sm:$0xff]  }
 0x20c   :  { %2966 = vrcp.f32 %v632_v60  ;;  %v3554_v60 = vld [vmem:[%s3852_s3 + $0x68] ss:$16 sps:$4 sm:$0xff]  }
 0x20d   :  { %2968 = vrcp.f32 %v639_v36  ;;  %v3592_v36 = vld [vmem:[%s3852_s3 + $0xa0] ss:$16 sps:$4 sm:$0xff]  }
 0x215   :  { %v2965_v63 = vpop.eup %2964 }
 0x216   :  { %v2967_v30 = vpop.eup %2966  ;;  %v643_v33 = vmul.f32 %v2965_v63, %v2963_v62  ;;  %v3568_v62 = vld [vmem:[%s3852_s3 + $0x8c] ss:$16 sps:$4 sm:$0xff]   ;;  %v3573_v63 = vld [vmem:[%s3852_s3 + $0x80] ss:$16 sps:$4 sm:$0xff]  }
 0x217   :  { %v642_v37 = vmul.f32 %v2967_v30, %v3352_v35  ;;  %v2969_v39 = vpop.eup %2968  ;;  %v3578_v30 = vld [vmem:[%s3852_s3 + $0x88] ss:$16 sps:$4 sm:$0xff]  }
 0x219   :  { %v3405_v38 = vadd.f32 %v643_v33, %v642_v37  ;;  %v3585_v33 = vld [vmem:[%s3852_s3 + $0xa4] ss:$16 sps:$4 sm:$0xff]   ;;  %v3597_v37 = vld [vmem:[%s3852_s3 + $0xa8] ss:$16 sps:$4 sm:$0xff]  }
 0x21b   :  { %2970 = vtanh.f32 %v3405_v38 }
 0x225   :  { %v2971_v40 = vpop.eup %2970 }
 0x226   :  { %v646_v41 = vmul.f32 %v2971_v40, %v2969_v39  ;;  %v3608_v39 = vld [vmem:[%s3852_s3 + $0xc4] ss:$16 sps:$4 sm:$0xff]   ;;  %v3613_v40 = vld [vmem:[%s3852_s3 + $0xcc] ss:$16 sps:$4 sm:$0xff]  }
 0x228   :  { %2602 = vst [vmem:[%s3856_s4 + $0x8] sm:$0xff] %v646_v41  ;;  %v654_v42 = vpack.c.bf16 %v646_v41, %v646_v41  ;;  %v3621_v41 = vld [vmem:[%s3852_s3 + $0xc0] ss:$16 sps:$4 sm:$0xff]  }
 0x22a   :  { %880 = vmatmul.mubr.bf16.vlgmr.msra.gmra.mrb[8].mxu0 %v654_v42  ;;  %921 = vmatmul.mubr.bf16.vlgmr.msra.gmra.mrb[8].mxu1 %v654_v42  ;;  %v3626_v42 = vld [vmem:[%s3852_s3 + $0xc8] ss:$16 sps:$4 sm:$0xff]  }
 0x22b   :  { %1158 = vmatpush1.bf16.msra.mxu0 %v3114_v2  ;;  %1199 = vmatpush1.bf16.msra.mxu1 %v3142_v7  ;;  %v2603_v2 = vld [vmem:[%s3854_s0 + $0x40] sm:$0xff] }
 0x22c   :  { %1159 = vmatprep.subr.bf16.mxu0 %v3120_v3  ;;  %1200 = vmatprep.subr.bf16.mxu1 %v3161_v10  ;;  %v2604_v3 = vld [vmem:[%s3854_s0 + $0x48] sm:$0xff] }
 0x22d   :  { %1189 = vmatprep.mubr.bf16.mxu0 %v3068_v1  ;;  %1230 = vmatprep.mubr.bf16.mxu1 %v3068_v1 }
 0x22f   :  { %1160 = vmatpush1.bf16.msra.mxu0 %v3126_v4  ;;  %1201 = vmatpush1.bf16.msra.mxu1 %v3166_v11 }
 0x230   :  { %1161 = vmatprep.subr.bf16.mxu0 %v3132_v5  ;;  %1202 = vmatprep.subr.bf16.mxu1 %v3183_v14 }
 0x233   :  { %1162 = vmatpush1.bf16.msra.mxu0 %v3148_v8  ;;  %1203 = vmatpush1.bf16.msra.mxu1 %v3190_v15 }
 0x234   :  { %1163 = vmatprep.subr.bf16.mxu0 %v3155_v9  ;;  %1204 = vmatprep.subr.bf16.mxu1 %v3196_v16 }
 0x237   :  { %1164 = vmatpush1.bf16.msra.mxu0 %v3173_v12  ;;  %1205 = vmatpush1.bf16.msra.mxu1 %v3214_v19  ;;  %v2605_v19 = vld [vmem:[%s3854_s0 + $0x50] sm:$0xff] }
 0x238   :  { %1165 = vmatprep.subr.bf16.mxu0 %v3178_v13  ;;  %1206 = vmatprep.subr.bf16.mxu1 %v3220_v20 }
 0x23b   :  { %1166 = vmatpush1.bf16.msra.mxu0 %v3202_v17  ;;  %1207 = vmatpush1.bf16.msra.mxu1 %v3238_v23  ;;  %v2606_v17 = vld [vmem:[%s3854_s0 + $0x58] sm:$0xff] }
 0x23c   :  { %1167 = vmatprep.subr.bf16.mxu0 %v3208_v18  ;;  %1208 = vmatprep.subr.bf16.mxu1 %v3249_v25 }
 0x23f   :  { %1168 = vmatpush1.bf16.msra.mxu0 %v3225_v21  ;;  %1209 = vmatpush1.bf16.msra.mxu1 %v3259_v27 }
 0x240   :  { %1169 = vmatprep.subr.bf16.mxu0 %v3231_v22  ;;  %1210 = vmatprep.subr.bf16.mxu1 %v3265_v28 }
 0x243   :  { %1170 = vmatpush1.bf16.msra.mxu0 %v3243_v24  ;;  %1211 = vmatpush1.bf16.msra.mxu1 %v3281_v31 }
 0x244   :  { %1171 = vmatprep.subr.bf16.mxu0 %v3254_v26  ;;  %1212 = vmatprep.subr.bf16.mxu1 %v3287_v32 }
 0x247   :  { %1172 = vmatpush1.bf16.msra.mxu0 %v3272_v29  ;;  %1213 = vmatpush1.bf16.msra.mxu1 %v3297_v34 }
 0x248   :  { %1467 = vmatprep.subr.bf16.mxu0 %v3467_v47  ;;  %1508 = vmatprep.subr.bf16.mxu1 %v3472_v48 }
 0x2fd   :  { %v881_v4 = vpop.f32.mrb[8].mxu0  ;;  %v922_v5 = vpop.f32.mrb[8].mxu1 }
 0x2fe   :  { %v929_v7 = vadd.f32 %v2603_v2, %v881_v4  ;;  %v883_v8 = vpop.f32.mrb[9].mxu0  ;;  %v924_v9 = vpop.f32.mrb[9].mxu1  ;;  %v931_v21 = vadd.f32 %v2605_v19, %v922_v5  ;;  %v3633_v2 = vld [vmem:[%s3852_s3 + $0xe4] ss:$16 sps:$4 sm:$0xff]   ;;  %v3645_v4 = vld [vmem:[%s3852_s3 + $0xe0] ss:$16 sps:$4 sm:$0xff]  }
 0x2ff   :  { %v930_v10 = vadd.f32 %v2604_v3, %v883_v8  ;;  %v885_v11 = vpop.f32.mrb[10].mxu0  ;;  %v926_v12 = vpop.f32.mrb[10].mxu1  ;;  %v932_v18 = vadd.f32 %v2606_v17, %v924_v9  ;;  %v3638_v3 = vld [vmem:[%s3852_s3 + $0xec] ss:$16 sps:$4 sm:$0xff]   ;;  %v3650_v5 = vld [vmem:[%s3852_s3 + $0xe8] ss:$16 sps:$4 sm:$0xff]  }
 0x300   :  { %v2639_v13 = vmul.f32 -1.442695, %v929_v7  ;;  %v886_v14 = vpop.f32.mrb[11].mxu0  ;;  %v927_v15 = vpop.f32.mrb[11].mxu1  ;;  %v2643_v7 = vld [vmem:[%s3854_s0 + $0x60] sm:$0xff]  ;;  %v2644_v8 = vld [vmem:[%s3854_s0 + $0x68] sm:$0xff] }
 0x301   :  { %v2640_v16 = vmul.f32 -1.442695, %v930_v10  ;;  %v2641_v20 = vmul.f32 -1.442695, %v932_v18 }
 0x302   :  { %2972 = vpow2.f32 %v2639_v13 }
 0x303   :  { %2974 = vpow2.f32 %v2640_v16 }
 0x304   :  { %2976 = vpow2.f32 %v2641_v20 }
 0x305   :  { %2978 = vtanh.f32 %v931_v21  ;;  %v2646_v21 = vld [vmem:[%s3854_s0 + $0x78] sm:$0xff] }
 0x30c   :  { %v2973_v22 = vpop.eup %2972 }
 0x30d   :  { %v2975_v23 = vpop.eup %2974  ;;  %v936_v24 = vadd.f32 1.0, %v2973_v22 }
 0x30e   :  { %v942_v25 = vadd.f32 1.0, %v2975_v23  ;;  %v2977_v26 = vpop.eup %2976  ;;  %v2645_v23 = vld [vmem:[%s3854_s0 + $0x70] sm:$0xff] }
 0x30f   :  { %2980 = vrcp.f32 %v936_v24  ;;  %v2979_v27 = vpop.eup %2978  ;;  %v949_v32 = vadd.f32 1.0, %v2977_v26 }
 0x310   :  { %2982 = vrcp.f32 %v942_v25 }
 0x311   :  { %2984 = vrcp.f32 %v949_v32 }
 0x319   :  { %v2981_v28 = vpop.eup %2980 }
 0x31a   :  { %v2983_v29 = vpop.eup %2982  ;;  %v953_v31 = vmul.f32 %v2981_v28, %v2979_v27 }
 0x31b   :  { %v952_v34 = vmul.f32 %v2983_v29, %v3405_v38  ;;  %v2985_v43 = vpop.eup %2984  ;;  %v3602_v38 = vld [vmem:[%s3852_s3 + $0xac] ss:$16 sps:$4 sm:$0xff]  }
 0x31d   :  { %v3456_v35 = vadd.f32 %v953_v31, %v952_v34 }
 0x31f   :  { %2986 = vtanh.f32 %v3456_v35 }
 0x329   :  { %v2987_v44 = vpop.eup %2986 }
 0x32a   :  { %v956_v45 = vmul.f32 %v2987_v44, %v2985_v43 }
 0x32c   :  { %2642 = vst [vmem:[%s3856_s4 + $0x10] sm:$0xff] %v956_v45  ;;  %v964_v46 = vpack.c.bf16 %v956_v45, %v956_v45 }
 0x32e   :  { %1190 = vmatmul.mubr.bf16.vlgmr.msra.gmra.mrb[12].mxu0 %v964_v46  ;;  %1231 = vmatmul.mubr.bf16.vlgmr.msra.gmra.mrb[12].mxu1 %v964_v46 }
 0x32f   :  { %1499 = vmatprep.mubr.bf16.mxu0 %v3068_v1  ;;  %1540 = vmatprep.mubr.bf16.mxu1 %v3068_v1 }
 0x330   :  { %1468 = vmatpush1.bf16.msra.mxu0 %v3477_v49  ;;  %1509 = vmatpush1.bf16.msra.mxu1 %v3482_v50 }
 0x331   :  { %1469 = vmatprep.subr.bf16.mxu0 %v3491_v0  ;;  %1510 = vmatprep.subr.bf16.mxu1 %v3496_v51 }
 0x334   :  { %1470 = vmatpush1.bf16.msra.mxu0 %v3501_v6  ;;  %1511 = vmatpush1.bf16.msra.mxu1 %v3506_v52 }
 0x335   :  { %1471 = vmatprep.subr.bf16.mxu0 %v3515_v53  ;;  %1512 = vmatprep.subr.bf16.mxu1 %v3520_v54 }
 0x338   :  { %1472 = vmatpush1.bf16.msra.mxu0 %v3525_v55  ;;  %1513 = vmatpush1.bf16.msra.mxu1 %v3530_v56 }
 0x339   :  { %1473 = vmatprep.subr.bf16.mxu0 %v3539_v57  ;;  %1514 = vmatprep.subr.bf16.mxu1 %v3544_v58 }
 0x33c   :  { %1474 = vmatpush1.bf16.msra.mxu0 %v3549_v59  ;;  %1515 = vmatpush1.bf16.msra.mxu1 %v3554_v60 }
 0x33d   :  { %1475 = vmatprep.subr.bf16.mxu0 %v3563_v61  ;;  %1516 = vmatprep.subr.bf16.mxu1 %v3568_v62 }
 0x340   :  { %1476 = vmatpush1.bf16.msra.mxu0 %v3573_v63  ;;  %1517 = vmatpush1.bf16.msra.mxu1 %v3578_v30 }
 0x341   :  { %1477 = vmatprep.subr.bf16.mxu0 %v3585_v33  ;;  %1518 = vmatprep.subr.bf16.mxu1 %v3602_v38 }
 0x344   :  { %1478 = vmatpush1.bf16.msra.mxu0 %v3592_v36  ;;  %1519 = vmatpush1.bf16.msra.mxu1 %v3597_v37 }
 0x345   :  { %1479 = vmatprep.subr.bf16.mxu0 %v3608_v39  ;;  %1520 = vmatprep.subr.bf16.mxu1 %v3613_v40 }
 0x348   :  { %1480 = vmatpush1.bf16.msra.mxu0 %v3621_v41  ;;  %1521 = vmatpush1.bf16.msra.mxu1 %v3626_v42 }
 0x349   :  { %1481 = vmatprep.subr.bf16.mxu0 %v3633_v2  ;;  %1522 = vmatprep.subr.bf16.mxu1 %v3638_v3 }
 0x34c   :  { %1482 = vmatpush1.bf16.msra.mxu0 %v3645_v4  ;;  %1523 = vmatpush1.bf16.msra.mxu1 %v3650_v5 }
 0x34d   :  { %1777 = vmatprep.subr.bf16.mxu0 %v3467_v47  ;;  %1818 = vmatprep.subr.bf16.mxu1 %v3472_v48 }
 0x401   :  { %v1191_v9 = vpop.f32.mrb[12].mxu0  ;;  %v1232_v10 = vpop.f32.mrb[12].mxu1 }
 0x402   :  { %v1239_v11 = vadd.f32 %v2643_v7, %v1191_v9  ;;  %v1193_v12 = vpop.f32.mrb[13].mxu0  ;;  %v1234_v13 = vpop.f32.mrb[13].mxu1  ;;  %v1241_v25 = vadd.f32 %v2645_v23, %v1232_v10 }
 0x403   :  { %v1240_v14 = vadd.f32 %v2644_v8, %v1193_v12  ;;  %v1195_v15 = vpop.f32.mrb[14].mxu0  ;;  %v1236_v16 = vpop.f32.mrb[14].mxu1  ;;  %v1242_v22 = vadd.f32 %v2646_v21, %v1234_v13  ;;  %v2684_v12 = vld [vmem:[%s3854_s0 + $0x88] sm:$0xff] }
 0x404   :  { %v2679_v17 = vmul.f32 -1.442695, %v1239_v11  ;;  %v1196_v18 = vpop.f32.mrb[15].mxu0  ;;  %v1237_v19 = vpop.f32.mrb[15].mxu1 }
 0x405   :  { %v2680_v20 = vmul.f32 -1.442695, %v1240_v14  ;;  %v2681_v24 = vmul.f32 -1.442695, %v1242_v22 }
 0x406   :  { %2988 = vpow2.f32 %v2679_v17 }
 0x407   :  { %2990 = vpow2.f32 %v2680_v20 }
 0x408   :  { %2992 = vpow2.f32 %v2681_v24 }
 0x409   :  { %2994 = vtanh.f32 %v1241_v25  ;;  %v2686_v25 = vld [vmem:[%s3854_s0 + $0x98] sm:$0xff] }
 0x410   :  { %v2989_v26 = vpop.eup %2988 }
 0x411   :  { %v2991_v27 = vpop.eup %2990  ;;  %v1246_v28 = vadd.f32 1.0, %v2989_v26 }
 0x412   :  { %v1252_v29 = vadd.f32 1.0, %v2991_v27  ;;  %v2993_v31 = vpop.eup %2992  ;;  %v2685_v27 = vld [vmem:[%s3854_s0 + $0x90] sm:$0xff] }
 0x413   :  { %2996 = vrcp.f32 %v1246_v28  ;;  %v2995_v32 = vpop.eup %2994  ;;  %v1259_v45 = vadd.f32 1.0, %v2993_v31 }
 0x414   :  { %2998 = vrcp.f32 %v1252_v29 }
 0x415   :  { %3000 = vrcp.f32 %v1259_v45 }
 0x41d   :  { %v2997_v34 = vpop.eup %2996 }
 0x41e   :  { %v2999_v43 = vpop.eup %2998  ;;  %v1263_v44 = vmul.f32 %v2997_v34, %v2995_v32 }
 0x41f   :  { %v1262_v46 = vmul.f32 %v2999_v43, %v3456_v35  ;;  %v3001_v8 = vpop.eup %3000  ;;  %v2683_v35 = vld [vmem:[%s3854_s0 + $0x80] sm:$0xff] }
 0x421   :  { %v3671_v7 = vadd.f32 %v1263_v44, %v1262_v46 }
 0x423   :  { %3002 = vtanh.f32 %v3671_v7 }
 0x42d   :  { %v3003_v9 = vpop.eup %3002 }
 0x42e   :  { %v1266_v10 = vmul.f32 %v3003_v9, %v3001_v8 }
 0x430   :  { %2682 = vst [vmem:[%s3856_s4 + $0x18] sm:$0xff] %v1266_v10  ;;  %v1274_v11 = vpack.c.bf16 %v1266_v10, %v1266_v10 }
 0x432   :  { %1500 = vmatmul.mubr.bf16.vlgmr.msra.gmra.mrb[16].mxu0 %v1274_v11  ;;  %1541 = vmatmul.mubr.bf16.vlgmr.msra.gmra.mrb[16].mxu1 %v1274_v11 }
 0x433   :  { %1778 = vmatpush1.bf16.msra.mxu0 %v3477_v49  ;;  %1819 = vmatpush1.bf16.msra.mxu1 %v3482_v50 }
 0x434   :  { %1779 = vmatprep.subr.bf16.mxu0 %v3491_v0  ;;  %1820 = vmatprep.subr.bf16.mxu1 %v3496_v51 }
 0x435   :  { %1809 = vmatprep.mubr.bf16.mxu0 %v3068_v1  ;;  %1850 = vmatprep.mubr.bf16.mxu1 %v3068_v1 }
 0x437   :  { %1780 = vmatpush1.bf16.msra.mxu0 %v3501_v6  ;;  %1821 = vmatpush1.bf16.msra.mxu1 %v3506_v52 }
 0x438   :  { %1781 = vmatprep.subr.bf16.mxu0 %v3515_v53  ;;  %1822 = vmatprep.subr.bf16.mxu1 %v3520_v54 }
 0x43b   :  { %1782 = vmatpush1.bf16.msra.mxu0 %v3525_v55  ;;  %1823 = vmatpush1.bf16.msra.mxu1 %v3530_v56 }
 0x43c   :  { %1783 = vmatprep.subr.bf16.mxu0 %v3539_v57  ;;  %1824 = vmatprep.subr.bf16.mxu1 %v3544_v58 }
 0x43f   :  { %1784 = vmatpush1.bf16.msra.mxu0 %v3549_v59  ;;  %1825 = vmatpush1.bf16.msra.mxu1 %v3554_v60 }
 0x440   :  { %1785 = vmatprep.subr.bf16.mxu0 %v3563_v61  ;;  %1826 = vmatprep.subr.bf16.mxu1 %v3568_v62 }
 0x443   :  { %1786 = vmatpush1.bf16.msra.mxu0 %v3573_v63  ;;  %1827 = vmatpush1.bf16.msra.mxu1 %v3578_v30 }
 0x444   :  { %1787 = vmatprep.subr.bf16.mxu0 %v3585_v33  ;;  %1828 = vmatprep.subr.bf16.mxu1 %v3602_v38 }
 0x447   :  { %1788 = vmatpush1.bf16.msra.mxu0 %v3592_v36  ;;  %1829 = vmatpush1.bf16.msra.mxu1 %v3597_v37 }
 0x448   :  { %1789 = vmatprep.subr.bf16.mxu0 %v3608_v39  ;;  %1830 = vmatprep.subr.bf16.mxu1 %v3613_v40 }
 0x44b   :  { %1790 = vmatpush1.bf16.msra.mxu0 %v3621_v41  ;;  %1831 = vmatpush1.bf16.msra.mxu1 %v3626_v42 }
 0x44c   :  { %1791 = vmatprep.subr.bf16.mxu0 %v3633_v2  ;;  %1832 = vmatprep.subr.bf16.mxu1 %v3638_v3 }
 0x44f   :  { %1792 = vmatpush1.bf16.msra.mxu0 %v3645_v4  ;;  %1833 = vmatpush1.bf16.msra.mxu1 %v3650_v5 }
 0x450   :  { %2087 = vmatprep.subr.bf16.mxu0 %v3467_v47  ;;  %2128 = vmatprep.subr.bf16.mxu1 %v3472_v48 }
 0x505   :  { %v1501_v13 = vpop.f32.mrb[16].mxu0  ;;  %v1542_v14 = vpop.f32.mrb[16].mxu1 }
 0x506   :  { %v1549_v15 = vadd.f32 %v2683_v35, %v1501_v13  ;;  %v1503_v16 = vpop.f32.mrb[17].mxu0  ;;  %v1544_v17 = vpop.f32.mrb[17].mxu1  ;;  %v1551_v29 = vadd.f32 %v2685_v27, %v1542_v14  ;;  %v2726_v27 = vld [vmem:[%s3854_s0 + $0xb8] sm:$0xff] }
 0x507   :  { %v1550_v18 = vadd.f32 %v2684_v12, %v1503_v16  ;;  %v1505_v19 = vpop.f32.mrb[18].mxu0  ;;  %v1546_v20 = vpop.f32.mrb[18].mxu1  ;;  %v1552_v26 = vadd.f32 %v2686_v25, %v1544_v17  ;;  %v2724_v16 = vld [vmem:[%s3854_s0 + $0xa8] sm:$0xff] }
 0x508   :  { %v2719_v21 = vmul.f32 -1.442695, %v1549_v15  ;;  %v1506_v22 = vpop.f32.mrb[19].mxu0  ;;  %v1547_v23 = vpop.f32.mrb[19].mxu1 }
 0x509   :  { %v2720_v24 = vmul.f32 -1.442695, %v1550_v18  ;;  %v2721_v28 = vmul.f32 -1.442695, %v1552_v26 }
 0x50a   :  { %3004 = vpow2.f32 %v2719_v21 }
 0x50b   :  { %3006 = vpow2.f32 %v2720_v24 }
 0x50c   :  { %3008 = vpow2.f32 %v2721_v28 }
 0x50d   :  { %3010 = vtanh.f32 %v1551_v29  ;;  %v2725_v29 = vld [vmem:[%s3854_s0 + $0xb0] sm:$0xff] }
 0x514   :  { %v3005_v31 = vpop.eup %3004 }
 0x515   :  { %v3007_v32 = vpop.eup %3006  ;;  %v1556_v34 = vadd.f32 1.0, %v3005_v31 }
 0x516   :  { %v1562_v43 = vadd.f32 1.0, %v3007_v32  ;;  %v3009_v44 = vpop.eup %3008 }
 0x517   :  { %3012 = vrcp.f32 %v1556_v34  ;;  %v3011_v45 = vpop.eup %3010  ;;  %v1569_v10 = vadd.f32 1.0, %v3009_v44 }
 0x518   :  { %3014 = vrcp.f32 %v1562_v43 }
 0x519   :  { %3016 = vrcp.f32 %v1569_v10 }
 0x521   :  { %v3013_v46 = vpop.eup %3012 }
 0x522   :  { %v3015_v8 = vpop.eup %3014  ;;  %v1573_v9 = vmul.f32 %v3013_v46, %v3011_v45 }
 0x523   :  { %v1572_v11 = vmul.f32 %v3015_v8, %v3671_v7  ;;  %v3017_v12 = vpop.eup %3016  ;;  %v2723_v7 = vld [vmem:[%s3854_s0 + $0xa0] sm:$0xff] }
 0x525   :  { %v3724_v35 = vadd.f32 %v1573_v9, %v1572_v11 }
 0x527   :  { %3018 = vtanh.f32 %v3724_v35 }
 0x531   :  { %v3019_v13 = vpop.eup %3018 }
 0x532   :  { %v1576_v14 = vmul.f32 %v3019_v13, %v3017_v12 }
 0x534   :  { %2722 = vst [vmem:[%s3856_s4 + $0x20] sm:$0xff] %v1576_v14  ;;  %v1584_v15 = vpack.c.bf16 %v1576_v14, %v1576_v14 }
 0x536   :  { %1810 = vmatmul.mubr.bf16.vlgmr.msra.gmra.mrb[20].mxu0 %v1584_v15  ;;  %1851 = vmatmul.mubr.bf16.vlgmr.msra.gmra.mrb[20].mxu1 %v1584_v15 }
 0x537   :  { %2088 = vmatpush1.bf16.msra.mxu0 %v3477_v49  ;;  %2129 = vmatpush1.bf16.msra.mxu1 %v3482_v50 }
 0x538   :  { %2089 = vmatprep.subr.bf16.mxu0 %v3491_v0  ;;  %2130 = vmatprep.subr.bf16.mxu1 %v3496_v51 }
 0x539   :  { %2119 = vmatprep.mubr.bf16.mxu0 %v3068_v1  ;;  %2160 = vmatprep.mubr.bf16.mxu1 %v3068_v1 }
 0x53b   :  { %2090 = vmatpush1.bf16.msra.mxu0 %v3501_v6  ;;  %2131 = vmatpush1.bf16.msra.mxu1 %v3506_v52 }
 0x53c   :  { %2091 = vmatprep.subr.bf16.mxu0 %v3515_v53  ;;  %2132 = vmatprep.subr.bf16.mxu1 %v3520_v54 }
 0x53f   :  { %2092 = vmatpush1.bf16.msra.mxu0 %v3525_v55  ;;  %2133 = vmatpush1.bf16.msra.mxu1 %v3530_v56 }
 0x540   :  { %2093 = vmatprep.subr.bf16.mxu0 %v3539_v57  ;;  %2134 = vmatprep.subr.bf16.mxu1 %v3544_v58 }
 0x543   :  { %2094 = vmatpush1.bf16.msra.mxu0 %v3549_v59  ;;  %2135 = vmatpush1.bf16.msra.mxu1 %v3554_v60 }
 0x544   :  { %2095 = vmatprep.subr.bf16.mxu0 %v3563_v61  ;;  %2136 = vmatprep.subr.bf16.mxu1 %v3568_v62 }
 0x547   :  { %2096 = vmatpush1.bf16.msra.mxu0 %v3573_v63  ;;  %2137 = vmatpush1.bf16.msra.mxu1 %v3578_v30 }
 0x548   :  { %2097 = vmatprep.subr.bf16.mxu0 %v3585_v33  ;;  %2138 = vmatprep.subr.bf16.mxu1 %v3602_v38 }
 0x54b   :  { %2098 = vmatpush1.bf16.msra.mxu0 %v3592_v36  ;;  %2139 = vmatpush1.bf16.msra.mxu1 %v3597_v37 }
 0x54c   :  { %2099 = vmatprep.subr.bf16.mxu0 %v3608_v39  ;;  %2140 = vmatprep.subr.bf16.mxu1 %v3613_v40 }
 0x54f   :  { %2100 = vmatpush1.bf16.msra.mxu0 %v3621_v41  ;;  %2141 = vmatpush1.bf16.msra.mxu1 %v3626_v42 }
 0x550   :  { %2101 = vmatprep.subr.bf16.mxu0 %v3633_v2  ;;  %2142 = vmatprep.subr.bf16.mxu1 %v3638_v3 }
 0x553   :  { %2102 = vmatpush1.bf16.msra.mxu0 %v3645_v4  ;;  %2143 = vmatpush1.bf16.msra.mxu1 %v3650_v5 }
 0x554   :  { %2397 = vmatprep.subr.bf16.mxu0 %v3467_v47  ;;  %2438 = vmatprep.subr.bf16.mxu1 %v3472_v48 }
 0x609   :  { %v1811_v17 = vpop.f32.mrb[20].mxu0  ;;  %v1852_v18 = vpop.f32.mrb[20].mxu1 }
 0x60a   :  { %v1859_v19 = vadd.f32 %v2723_v7, %v1811_v17  ;;  %v1813_v20 = vpop.f32.mrb[21].mxu0  ;;  %v1854_v21 = vpop.f32.mrb[21].mxu1  ;;  %v1861_v32 = vadd.f32 %v2725_v29, %v1852_v18 }
 0x60b   :  { %v1860_v22 = vadd.f32 %v2724_v16, %v1813_v20  ;;  %v1815_v23 = vpop.f32.mrb[22].mxu0  ;;  %v1856_v24 = vpop.f32.mrb[22].mxu1  ;;  %v1862_v28 = vadd.f32 %v2726_v27, %v1854_v21  ;;  %v2803_v21 = vld [vmem:[%s3854_s0 + $0xe0] sm:$0xff] }
 0x60c   :  { %v2759_v25 = vmul.f32 -1.442695, %v1859_v19  ;;  %v1816_v47 = vpop.f32.mrb[23].mxu0  ;;  %v1857_v26 = vpop.f32.mrb[23].mxu1 }
 0x60d   :  { %v2760_v48 = vmul.f32 -1.442695, %v1860_v22  ;;  %v2761_v31 = vmul.f32 -1.442695, %v1862_v28  ;;  %v2804_v22 = vld [vmem:[%s3854_s0 + $0xe8] sm:$0xff] }
 0x60e   :  { %3020 = vpow2.f32 %v2759_v25 }
 0x60f   :  { %3022 = vpow2.f32 %v2760_v48 }
 0x610   :  { %3024 = vpow2.f32 %v2761_v31 }
 0x611   :  { %3026 = vtanh.f32 %v1861_v32 }
 0x618   :  { %v3021_v34 = vpop.eup %3020 }
 0x619   :  { %v3023_v43 = vpop.eup %3022  ;;  %v1866_v44 = vadd.f32 1.0, %v3021_v34 }
 0x61a   :  { %v1872_v45 = vadd.f32 1.0, %v3023_v43  ;;  %v3025_v46 = vpop.eup %3024  ;;  %v2806_v43 = vld [vmem:[%s3854_s0 + $0xf8] sm:$0xff] }
 0x61b   :  { %3028 = vrcp.f32 %v1866_v44  ;;  %v3027_v8 = vpop.eup %3026  ;;  %v1879_v12 = vadd.f32 1.0, %v3025_v46 }
 0x61c   :  { %3030 = vrcp.f32 %v1872_v45  ;;  %v2805_v45 = vld [vmem:[%s3854_s0 + $0xf0] sm:$0xff] }
 0x61d   :  { %3032 = vrcp.f32 %v1879_v12 }
 0x625   :  { %v3029_v9 = vpop.eup %3028 }
 0x626   :  { %v3031_v10 = vpop.eup %3030  ;;  %v1883_v11 = vmul.f32 %v3029_v9, %v3027_v8 }
 0x627   :  { %v1882_v13 = vmul.f32 %v3031_v10, %v3724_v35  ;;  %v3033_v15 = vpop.eup %3032 }
 0x629   :  { %v3777_v14 = vadd.f32 %v1883_v11, %v1882_v13 }
 0x62b   :  { %3034 = vtanh.f32 %v3777_v14 }
 0x635   :  { %v3035_v7 = vpop.eup %3034 }
 0x636   :  { %v1886_v16 = vmul.f32 %v3035_v7, %v3033_v15 }
 0x638   :  { %2762 = vst [vmem:[%s3856_s4 + $0x28] sm:$0xff] %v1886_v16  ;;  %v1894_v17 = vpack.c.bf16 %v1886_v16, %v1886_v16 }
 0x63a   :  { %2120 = vmatmul.mubr.bf16.vlgmr.msra.gmra.mrb[24].mxu0 %v1894_v17  ;;  %2161 = vmatmul.mubr.bf16.vlgmr.msra.gmra.mrb[24].mxu1 %v1894_v17 }
 0x63b   :  { %2398 = vmatpush1.bf16.msra.mxu0 %v3477_v49  ;;  %2439 = vmatpush1.bf16.msra.mxu1 %v3482_v50  ;;  %v2764_v49 = vld [vmem:[%s3854_s0 + $0xc8] sm:$0xff] }
 0x63c   :  { %2399 = vmatprep.subr.bf16.mxu0 %v3491_v0  ;;  %2440 = vmatprep.subr.bf16.mxu1 %v3496_v51 }
 0x63d   :  { %2429 = vmatprep.mubr.bf16.mxu0 %v3068_v1  ;;  %2470 = vmatprep.mubr.bf16.mxu1 %v3068_v1  ;;  %v2763_v1 = vld [vmem:[%s3854_s0 + $0xc0] sm:$0xff] }
 0x63f   :  { %2400 = vmatpush1.bf16.msra.mxu0 %v3501_v6  ;;  %2441 = vmatpush1.bf16.msra.mxu1 %v3506_v52 }
 0x640   :  { %2401 = vmatprep.subr.bf16.mxu0 %v3515_v53  ;;  %2442 = vmatprep.subr.bf16.mxu1 %v3520_v54 }
 0x643   :  { %2402 = vmatpush1.bf16.msra.mxu0 %v3525_v55  ;;  %2443 = vmatpush1.bf16.msra.mxu1 %v3530_v56 }
 0x644   :  { %2403 = vmatprep.subr.bf16.mxu0 %v3539_v57  ;;  %2444 = vmatprep.subr.bf16.mxu1 %v3544_v58 }
 0x647   :  { %2404 = vmatpush1.bf16.msra.mxu0 %v3549_v59  ;;  %2445 = vmatpush1.bf16.msra.mxu1 %v3554_v60  ;;  %v2766_v60 = vld [vmem:[%s3854_s0 + $0xd8] sm:$0xff] }
 0x648   :  { %2405 = vmatprep.subr.bf16.mxu0 %v3563_v61  ;;  %2446 = vmatprep.subr.bf16.mxu1 %v3568_v62  ;;  %v2765_v62 = vld [vmem:[%s3854_s0 + $0xd0] sm:$0xff] }
 0x64b   :  { %2406 = vmatpush1.bf16.msra.mxu0 %v3573_v63  ;;  %2447 = vmatpush1.bf16.msra.mxu1 %v3578_v30 }
 0x64c   :  { %2407 = vmatprep.subr.bf16.mxu0 %v3585_v33  ;;  %2448 = vmatprep.subr.bf16.mxu1 %v3602_v38 }
 0x64f   :  { %2408 = vmatpush1.bf16.msra.mxu0 %v3592_v36  ;;  %2449 = vmatpush1.bf16.msra.mxu1 %v3597_v37 }
 0x650   :  { %2409 = vmatprep.subr.bf16.mxu0 %v3608_v39  ;;  %2450 = vmatprep.subr.bf16.mxu1 %v3613_v40 }
 0x653   :  { %2410 = vmatpush1.bf16.msra.mxu0 %v3621_v41  ;;  %2451 = vmatpush1.bf16.msra.mxu1 %v3626_v42 }
 0x654   :  { %2411 = vmatprep.subr.bf16.mxu0 %v3633_v2  ;;  %2452 = vmatprep.subr.bf16.mxu1 %v3638_v3 }
 0x657   :  { %2412 = vmatpush1.bf16.msra.mxu0 %v3645_v4  ;;  %2453 = vmatpush1.bf16.msra.mxu1 %v3650_v5 }
 0x70d   :  { %v2121_v50 = vpop.f32.mrb[24].mxu0  ;;  %v2162_v0 = vpop.f32.mrb[24].mxu1 }
 0x70e   :  { %v2169_v51 = vadd.f32 %v2763_v1, %v2121_v50  ;;  %v2123_v6 = vpop.f32.mrb[25].mxu0  ;;  %v2164_v52 = vpop.f32.mrb[25].mxu1  ;;  %v2171_v30 = vadd.f32 %v2765_v62, %v2162_v0 }
 0x70f   :  { %v2170_v53 = vadd.f32 %v2764_v49, %v2123_v6  ;;  %v2125_v54 = vpop.f32.mrb[26].mxu0  ;;  %v2166_v55 = vpop.f32.mrb[26].mxu1  ;;  %v2172_v61 = vadd.f32 %v2766_v60, %v2164_v52 }
 0x710   :  { %v2799_v56 = vmul.f32 -1.442695, %v2169_v51  ;;  %v2126_v57 = vpop.f32.mrb[27].mxu0  ;;  %v2167_v58 = vpop.f32.mrb[27].mxu1 }
 0x711   :  { %v2800_v59 = vmul.f32 -1.442695, %v2170_v53  ;;  %v2801_v63 = vmul.f32 -1.442695, %v2172_v61 }
 0x712   :  { %3036 = vpow2.f32 %v2799_v56 }
 0x713   :  { %3038 = vpow2.f32 %v2800_v59 }
 0x714   :  { %3040 = vpow2.f32 %v2801_v63 }
 0x715   :  { %3042 = vtanh.f32 %v2171_v30 }
 0x71c   :  { %v3037_v33 = vpop.eup %3036 }
 0x71d   :  { %v3039_v36 = vpop.eup %3038  ;;  %v2176_v37 = vadd.f32 1.0, %v3037_v33 }
 0x71e   :  { %v2182_v38 = vadd.f32 1.0, %v3039_v36  ;;  %v3041_v39 = vpop.eup %3040 }
 0x71f   :  { %3044 = vrcp.f32 %v2176_v37  ;;  %v3043_v40 = vpop.eup %3042  ;;  %v2189_v3 = vadd.f32 1.0, %v3041_v39 }
 0x720   :  { %3046 = vrcp.f32 %v2182_v38 }
 0x721   :  { %3048 = vrcp.f32 %v2189_v3 }
 0x729   :  { %v3045_v41 = vpop.eup %3044 }
 0x72a   :  { %v3047_v42 = vpop.eup %3046  ;;  %v2193_v2 = vmul.f32 %v3045_v41, %v3043_v40 }
 0x72b   :  { %v2192_v4 = vmul.f32 %v3047_v42, %v3777_v14  ;;  %v3049_v35 = vpop.eup %3048 }
 0x72d   :  { %v2194_v5 = vadd.f32 %v2193_v2, %v2192_v4 }
 0x72f   :  { %3050 = vtanh.f32 %v2194_v5 }
 0x739   :  { %v3051_v18 = vpop.eup %3050 }
 0x73a   :  { %v2196_v19 = vmul.f32 %v3051_v18, %v3049_v35 }
 0x73c   :  { %2802 = vst [vmem:[%s3856_s4 + $0x30] sm:$0xff] %v2196_v19  ;;  %v2204_v20 = vpack.c.bf16 %v2196_v19, %v2196_v19 }
 0x73e   :  { %2430 = vmatmul.mubr.bf16.vlgmr.msra.gmra.mrb[28].mxu0 %v2204_v20  ;;  %2471 = vmatmul.mubr.bf16.vlgmr.msra.gmra.mrb[28].mxu1 %v2204_v20 }
 0x811   :  { %v2431_v23 = vpop.f32.mrb[28].mxu0  ;;  %v2472_v24 = vpop.f32.mrb[28].mxu1 }
 0x812   :  { %v2479_v25 = vadd.f32 %v2803_v21, %v2431_v23  ;;  %v2433_v47 = vpop.f32.mrb[29].mxu0  ;;  %v2474_v26 = vpop.f32.mrb[29].mxu1  ;;  %v2481_v8 = vadd.f32 %v2805_v45, %v2472_v24 }
 0x813   :  { %v2480_v48 = vadd.f32 %v2804_v22, %v2433_v47  ;;  %v2435_v27 = vpop.f32.mrb[30].mxu0  ;;  %v2476_v28 = vpop.f32.mrb[30].mxu1  ;;  %v2482_v44 = vadd.f32 %v2806_v43, %v2474_v26 }
 0x814   :  { %v2839_v29 = vmul.f32 -1.442695, %v2479_v25  ;;  %v2436_v31 = vpop.f32.mrb[31].mxu0  ;;  %v2477_v32 = vpop.f32.mrb[31].mxu1 }
 0x815   :  { %v2840_v34 = vmul.f32 -1.442695, %v2480_v48  ;;  %v2841_v46 = vmul.f32 -1.442695, %v2482_v44 }
 0x816   :  { %3052 = vpow2.f32 %v2839_v29 }
 0x817   :  { %3054 = vpow2.f32 %v2840_v34 }
 0x818   :  { %3056 = vpow2.f32 %v2841_v46 }
 0x819   :  { %3058 = vtanh.f32 %v2481_v8 }
 0x820   :  { %v3053_v9 = vpop.eup %3052 }
 0x821   :  { %v3055_v10 = vpop.eup %3054  ;;  %v2486_v11 = vadd.f32 1.0, %v3053_v9 }
 0x822   :  { %v2492_v12 = vadd.f32 1.0, %v3055_v10  ;;  %v3057_v13 = vpop.eup %3056 }
 0x823   :  { %3060 = vrcp.f32 %v2486_v11  ;;  %v3059_v14 = vpop.eup %3058  ;;  %v2499_v17 = vadd.f32 1.0, %v3057_v13 }
 0x824   :  { %3062 = vrcp.f32 %v2492_v12 }
 0x825   :  { %3064 = vrcp.f32 %v2499_v17 }
 0x82d   :  { %v3061_v15 = vpop.eup %3060 }
 0x82e   :  { %v3063_v7 = vpop.eup %3062  ;;  %v2503_v16 = vmul.f32 %v3061_v15, %v3059_v14 }
 0x82f   :  { %v2502_v1 = vmul.f32 %v3063_v7, %v2194_v5  ;;  %v3065_v50 = vpop.eup %3064 }
 0x831   :  { %v2504_v49 = vadd.f32 %v2503_v16, %v2502_v1 }
 0x833   :  { %3066 = vtanh.f32 %v2504_v49  ;;  %2515 = vst [vmem:[%s3857_s6] sm:$0xff] %v2504_v49 }
 0x83d   :  { %v3067_v0 = vpop.eup %3066 }
 0x83e   :  { %v2506_v51 = vmul.f32 %v3067_v0, %v3065_v50 }
 0x840   :  { %2842 = vst [vmem:[%s3856_s4 + $0x38] sm:$0xff] %v2506_v51  ;;  %2514 = vst [vmem:[%s3858_s5] sm:$0xff] %v2506_v51 }

</bundles_post_ra>
